<compile_context>
chip_gen: v5e
topology: v5e:2x2
jax: 0.10.0
libtpu: 0.0.40
codegen_flags: <defaults>
</compile_context>

<pallas_src>
import functools
import math

import jax
import jax.numpy as jnp
from jax.experimental import pallas as pl
from jax.experimental.pallas import tpu as pltpu


def _round_up(x, m):
    return ((x + m - 1) // m) * m


def item_conv_kernel(emb_k_ref, emb_i_ref, a_ref, wt_ref, out_ref,
                     x_ref, y_ref, acc_ref, mm_ref,
                     *, tile_r, tile_k, inv_layers_p1):
    l = pl.program_id(0)
    i = pl.program_id(1)
    k = pl.program_id(2)
    last_l = pl.num_programs(0) - 1
    last_k = pl.num_programs(2) - 1

    kk = pl.multiple_of(k * tile_k, tile_k)

    # ---- build this layer's y = x_{l-1} @ W_l^T one k-tile at a time (i == 0) ----
    # Spreading the E x E matmul across the k loop hides it under the A-tile DMA
    # instead of forming a serial per-layer prologue bubble.
    @pl.when(i == 0)
    def _compute_y_tile():
        @pl.when(l == 0)
        def _():
            y_ref[pl.ds(kk, tile_k), :] = jnp.dot(
                emb_k_ref[...], wt_ref[...],
                preferred_element_type=jnp.float32).astype(jnp.bfloat16)

        @pl.when(l > 0)
        def _():
            y_ref[pl.ds(kk, tile_k), :] = jnp.dot(
                x_ref[pl.ds(kk, tile_k), :], wt_ref[...],
                preferred_element_type=jnp.float32).astype(jnp.bfloat16)

    # ---- x_l[row tile i] = A[row tile i] @ y, contracted over k tiles (bf16 MXU) --
    @pl.when(k == 0)
    def _zero_mm():
        mm_ref[...] = jnp.zeros_like(mm_ref)

    mm_ref[...] += jnp.dot(a_ref[...], y_ref[pl.ds(kk, tile_k), :],
                           preferred_element_type=jnp.float32)

    # ---- finalize this row tile for this layer ------------------------------------
    @pl.when(k == last_k)
    def _finalize():
        row = pl.ds(pl.multiple_of(i * tile_r, tile_r), tile_r)
        x_new = mm_ref[...]

        @pl.when(l != last_l)
        def _():
            x_ref[row, :] = x_new                   # un-normalized carry for next layer

        sq = jnp.sum(x_new * x_new, axis=-1, keepdims=True)
        # rsqrt(max(sq, 1e-24)) == 1 / max(||x||, 1e-12)  -> F.normalize semantics
        contrib = x_new * jax.lax.rsqrt(jnp.maximum(sq, 1e-24))

        @pl.when(l == 0)
        def _():
            acc_ref[row, :] = emb_i_ref[...] + contrib     # layer-0 term + this layer

        @pl.when(l > 0)
        def _():
            acc_ref[row, :] = acc_ref[row, :] + contrib

        # Every writeback carries valid data (running sum); the last layer's write,
        # scaled by 1/(L+1), is the final value that lands in HBM last.
        out_ref[...] = acc_ref[row, :] * jnp.where(l == last_l, inv_layers_p1, 1.0)


def item_conv(adjacency, embedding, weights, *, tile_r=256, tile_k=256):
    """adjacency: dense [N, N] float (densified sparse COO); embedding: [N, E];
    weights: [L, E, E] in PyTorch nn.Linear layout (y = x @ W^T)."""
    N, E = embedding.shape
    L = weights.shape[0]
    assert adjacency.shape == (N, N)
    assert weights.shape[1:] == (E, E)
    if L == 0:
        return embedding.astype(jnp.float32)

    E_pad = _round_up(max(E, 128), 128)
    step = tile_r * tile_k // math.gcd(tile_r, tile_k)
    N_pad = _round_up(max(N, step), step)
    nt_r = N_pad // tile_r
    nt_k = N_pad // tile_k

    emb_p = jnp.zeros((N_pad, E_pad), jnp.float32).at[:N, :E].set(
        embedding.astype(jnp.float32))
    # Adjacency streamed as bf16 (halves the dominant HBM traffic); f32 accumulation.
    adj_p = jnp.zeros((N_pad, N_pad), jnp.bfloat16).at[:N, :N].set(
        adjacency.astype(jnp.bfloat16))
    # Pre-transpose the Linear weights so the kernel never transposes on-chip.
    wt = jnp.transpose(weights.astype(jnp.float32), (0, 2, 1))       # [L, E_in, E_out]
    wt_p = jnp.zeros((L, E_pad, E_pad), jnp.float32).at[:, :E, :E].set(wt)

    kernel = functools.partial(item_conv_kernel, tile_r=tile_r, tile_k=tile_k,
                               inv_layers_p1=1.0 / float(L + 1))

    f32, bf16 = 4, 2
    vmem_bytes = (
        f32 * N_pad * E_pad                 # x   (un-normalized layer carry)
        + bf16 * N_pad * E_pad              # y   (x @ W^T, bf16 MXU operand)
        + f32 * N_pad * E_pad               # acc (running normalized sum)
        + f32 * tile_r * E_pad              # per-row-tile matmul accumulator
        + 2 * (bf16 * tile_r * tile_k       # streamed A tiles (double-buffered)
               + f32 * tile_k * E_pad       # embedding k-tiles (layer-0 y)
               + f32 * tile_r * E_pad       # embedding i-tiles (acc init)
               + f32 * E_pad * E_pad        # per-layer W^T
               + f32 * tile_r * E_pad))     # output tile
    try:
        vmem_cap = int(pltpu.get_tpu_info().vmem_capacity_bytes)
    except Exception:  # pragma: no cover - fall back to the smallest (v7x) capacity
        vmem_cap = 64 << 20
    vmem_limit = min(max(vmem_bytes + (8 << 20), 32 << 20), vmem_cap - (4 << 20))

    def emb_k_map(l, i, k):
        # Only needed while building layer 0's y (l == 0, i == 0); pin the block
        # index elsewhere so the pipeline skips redundant HBM re-fetches.
        return (jnp.where((l == 0) & (i == 0), k, 0), 0)

    def emb_i_map(l, i, k):
        # Only needed for the layer-0 accumulator init; pin for l > 0.
        return (jnp.where(l == 0, i, 0), 0)

    out_p = pl.pallas_call(
        kernel,
        out_shape=jax.ShapeDtypeStruct((N_pad, E_pad), jnp.float32),
        grid=(L, nt_r, nt_k),
        in_specs=[
            pl.BlockSpec((tile_k, E_pad), emb_k_map),                       # embedding (k-tiles)
            pl.BlockSpec((tile_r, E_pad), emb_i_map),                       # embedding (i-tiles)
            pl.BlockSpec((tile_r, tile_k), lambda l, i, k: (i, k)),         # adjacency (bf16 stream)
            pl.BlockSpec((None, E_pad, E_pad), lambda l, i, k: (l, 0, 0)),  # W_l^T (per layer)
        ],
        out_specs=pl.BlockSpec((tile_r, E_pad), lambda l, i, k: (i, 0)),
        scratch_shapes=[
            pltpu.VMEM((N_pad, E_pad), jnp.float32),    # x   (un-normalized layer carry)
            pltpu.VMEM((N_pad, E_pad), jnp.bfloat16),   # y   (x @ W_l^T)
            pltpu.VMEM((N_pad, E_pad), jnp.float32),    # acc (running normalized sum)
            pltpu.VMEM((tile_r, E_pad), jnp.float32),   # per-row-tile matmul accumulator
        ],
        compiler_params=pltpu.CompilerParams(
            dimension_semantics=("arbitrary", "arbitrary", "arbitrary"),
            vmem_limit_bytes=int(vmem_limit),
        ),
    )(emb_p, emb_p, adj_p, wt_p)

    return out_p[:N, :E]


def item_conv_reference(adjacency, embedding, weights):
    """Plain-JAX mirror of ItemConv.forward (dense adjacency stands in for sparse.mm)."""
    hp = jax.lax.Precision.HIGHEST
    L = weights.shape[0]
    x = embedding
    final = [x]
    for i in range(L):
        x = jnp.dot(x, weights[i].T, precision=hp)
        x = jnp.dot(adjacency, x, precision=hp)
        n = jnp.maximum(jnp.linalg.norm(x, axis=-1, keepdims=True), 1e-12)
        final.append(x / n)
    return sum(final) / (L + 1)


if __name__ == "__main__":
    key = jax.random.PRNGKey(0)
    N, E, LAYERS = 200, 100, 2        # n_items, emb_size (module default 100), layers

    k_adj, k_emb, k_w = jax.random.split(key, 3)

    embedding = jax.random.normal(k_emb, (N, E), dtype=jnp.float32)

    # Dense stand-in for the scipy-COO item adjacency (self-loops, row-normalized).
    adj = (jax.random.uniform(k_adj, (N, N)) > 0.9).astype(jnp.float32)
    adj = adj + jnp.eye(N, dtype=jnp.float32)
    adjacency = adj / jnp.sum(adj, axis=1, keepdims=True)

    # Stacked nn.Linear(E, E, bias=False) weights, PyTorch-style uniform init.
    bound = 1.0 / math.sqrt(E)
    weights = jax.random.uniform(k_w, (LAYERS, E, E), minval=-bound, maxval=bound,
                                 dtype=jnp.float32)

    out = item_conv(adjacency, embedding, weights)
    out = jax.block_until_ready(out)

    ref = item_conv_reference(adjacency, embedding, weights)
    assert out.shape == (N, E)
    # Slightly relaxed tolerance: adjacency / y operands are streamed in bf16
    # (f32 MXU accumulation); reference uses full-f32 HIGHEST precision.
    assert jnp.allclose(out, ref, atol=3e-3, rtol=3e-3), "mismatch vs reference"

    print("KERNEL_OK")
</pallas_src>

<mosaic_0001>
module attributes {stable_mosaic.version = 11 : i64} {
  func.func @item_conv_kernel(%arg0: i32, %arg1: i32, %arg2: i32, %arg3: memref<256x128xf32, #tpu.memory_space<vmem>>, %arg4: memref<256x128xf32, #tpu.memory_space<vmem>>, %arg5: memref<256x256xbf16, #tpu.memory_space<vmem>>, %arg6: memref<1x128x128xf32, #tpu.memory_space<vmem>>, %arg7: memref<256x128xf32, #tpu.memory_space<vmem>>, %arg8: memref<256x128xf32, #tpu.memory_space<vmem>>, %arg9: memref<256x128xbf16, #tpu.memory_space<vmem>>, %arg10: memref<256x128xf32, #tpu.memory_space<vmem>>, %arg11: memref<256x128xf32, #tpu.memory_space<vmem>>) attributes {dimension_semantics = [#tpu.dimension_semantics<arbitrary>, #tpu.dimension_semantics<arbitrary>, #tpu.dimension_semantics<arbitrary>], iteration_bounds = array<i64: 2, 1, 1>, scalar_prefetch = 0 : i64, scratch_operands = 4 : i64, tpu.core_type = #tpu.core_type<tc>, window_params = [{transform_indices = @transform_0, window_bounds = array<i64: 256, 128>}, {transform_indices = @transform_1, window_bounds = array<i64: 256, 128>}, {transform_indices = @transform_2, window_bounds = array<i64: 256, 256>}, {transform_indices = @transform_3, window_bounds = array<i64: 1, 128, 128>}, {transform_indices = @transform_4, window_bounds = array<i64: 256, 128>}]} {
    %c256_i32 = arith.constant 256 : i32
    %0 = arith.muli %arg2, %c256_i32 : i32
    %1 = tpu.assume_multiple %0, 256 : i32
    %c0_i32 = arith.constant 0 : i32
    %2 = arith.cmpi eq, %arg1, %c0_i32 : i32
    %3 = arith.extui %2 : i1 to i32
    %c0_i32_0 = arith.constant 0 : i32
    %4 = arith.cmpi ne, %3, %c0_i32_0 : i32
    scf.if %4 {
      %c0_i32_11 = arith.constant 0 : i32
      %18 = arith.cmpi eq, %arg0, %c0_i32_11 : i32
      %19 = arith.extui %18 : i1 to i32
      %c0_i32_12 = arith.constant 0 : i32
      %20 = arith.cmpi ne, %19, %c0_i32_12 : i32
      scf.if %20 {
        %c0_15 = arith.constant 0 : index
        %c0_16 = arith.constant 0 : index
        %24 = vector.load %arg3[%c0_15, %c0_16] : memref<256x128xf32, #tpu.memory_space<vmem>>, vector<256x128xf32>
        %c0_17 = arith.constant 0 : index
        %c0_18 = arith.constant 0 : index
        %c0_19 = arith.constant 0 : index
        %25 = vector.load %arg6[%c0_17, %c0_18, %c0_19] : memref<1x128x128xf32, #tpu.memory_space<vmem>>, vector<1x128x128xf32>
        %26 = vector.shape_cast %25 : vector<1x128x128xf32> to vector<128x128xf32>
        %cst_20 = arith.constant dense<0.000000e+00> : vector<256x128xf32>
        %27 = tpu.matmul %24, %26, %cst_20 {dimension_numbers = #tpu.dot_dimension_numbers<[1], [0], [0], [1], [0, 0, 1, 1], [], []>} : vector<256x128xf32>, vector<128x128xf32>, vector<256x128xf32> -> vector<256x128xf32>
        %28 = arith.truncf %27 : vector<256x128xf32> to vector<256x128xbf16>
        %29 = arith.index_cast %1 : i32 to index
        %c0_21 = arith.constant 0 : index
        %30 = vector.load %arg9[%29, %c0_21] : memref<256x128xbf16, #tpu.memory_space<vmem>>, vector<256x128xbf16>
        tpu.vector_store %arg9[%29, %c0_21], %28 {strides = array<i32>} : memref<256x128xbf16, #tpu.memory_space<vmem>>, vector<256x128xbf16>,
      } else {
      }
      %c0_i32_13 = arith.constant 0 : i32
      %21 = arith.cmpi sgt, %arg0, %c0_i32_13 : i32
      %22 = arith.extui %21 : i1 to i32
      %c0_i32_14 = arith.constant 0 : i32
      %23 = arith.cmpi ne, %22, %c0_i32_14 : i32
      scf.if %23 {
        %24 = arith.index_cast %1 : i32 to index
        %c0_15 = arith.constant 0 : index
        %25 = vector.load %arg8[%24, %c0_15] : memref<256x128xf32, #tpu.memory_space<vmem>>, vector<256x128xf32>
        %c0_16 = arith.constant 0 : index
        %c0_17 = arith.constant 0 : index
        %c0_18 = arith.constant 0 : index
        %26 = vector.load %arg6[%c0_16, %c0_17, %c0_18] : memref<1x128x128xf32, #tpu.memory_space<vmem>>, vector<1x128x128xf32>
        %27 = vector.shape_cast %26 : vector<1x128x128xf32> to vector<128x128xf32>
        %cst_19 = arith.constant dense<0.000000e+00> : vector<256x128xf32>
        %28 = tpu.matmul %25, %27, %cst_19 {dimension_numbers = #tpu.dot_dimension_numbers<[1], [0], [0], [1], [0, 0, 1, 1], [], []>} : vector<256x128xf32>, vector<128x128xf32>, vector<256x128xf32> -> vector<256x128xf32>
        %29 = arith.truncf %28 : vector<256x128xf32> to vector<256x128xbf16>
        %30 = arith.index_cast %1 : i32 to index
        %c0_20 = arith.constant 0 : index
        %31 = vector.load %arg9[%30, %c0_20] : memref<256x128xbf16, #tpu.memory_space<vmem>>, vector<256x128xbf16>
        tpu.vector_store %arg9[%30, %c0_20], %29 {strides = array<i32>} : memref<256x128xbf16, #tpu.memory_space<vmem>>, vector<256x128xbf16>,
      } else {
      }
    } else {
    }
    %c0_i32_1 = arith.constant 0 : i32
    %5 = arith.cmpi eq, %arg2, %c0_i32_1 : i32
    %6 = arith.extui %5 : i1 to i32
    %c0_i32_2 = arith.constant 0 : i32
    %7 = arith.cmpi ne, %6, %c0_i32_2 : i32
    scf.if %7 {
      %cst_11 = arith.constant 0.000000e+00 : f32
      %18 = vector.broadcast %cst_11 : f32 to vector<256x128xf32>
      %c0_12 = arith.constant 0 : index
      %c0_13 = arith.constant 0 : index
      %19 = vector.load %arg11[%c0_12, %c0_13] : memref<256x128xf32, #tpu.memory_space<vmem>>, vector<256x128xf32>
      tpu.vector_store %arg11[%c0_12, %c0_13], %18 {strides = array<i32>} : memref<256x128xf32, #tpu.memory_space<vmem>>, vector<256x128xf32>,
    } else {
    }
    %c0 = arith.constant 0 : index
    %c0_3 = arith.constant 0 : index
    %8 = vector.load %arg11[%c0, %c0_3] : memref<256x128xf32, #tpu.memory_space<vmem>>, vector<256x128xf32>
    %c0_4 = arith.constant 0 : index
    %c0_5 = arith.constant 0 : index
    %9 = vector.load %arg5[%c0_4, %c0_5] : memref<256x256xbf16, #tpu.memory_space<vmem>>, vector<256x256xbf16>
    %10 = arith.index_cast %1 : i32 to index
    %c0_6 = arith.constant 0 : index
    %11 = vector.load %arg9[%10, %c0_6] : memref<256x128xbf16, #tpu.memory_space<vmem>>, vector<256x128xbf16>
    %cst = arith.constant dense<0.000000e+00> : vector<256x128xf32>
    %12 = tpu.matmul %9, %11, %cst {dimension_numbers = #tpu.dot_dimension_numbers<[1], [0], [0], [1], [0, 0, 1, 1], [], []>} : vector<256x256xbf16>, vector<256x128xbf16>, vector<256x128xf32> -> vector<256x128xf32>
    %13 = arith.addf %8, %12 : vector<256x128xf32>
    %c0_7 = arith.constant 0 : index
    %c0_8 = arith.constant 0 : index
    %14 = vector.load %arg11[%c0_7, %c0_8] : memref<256x128xf32, #tpu.memory_space<vmem>>, vector<256x128xf32>
    tpu.vector_store %arg11[%c0_7, %c0_8], %13 {strides = array<i32>} : memref<256x128xf32, #tpu.memory_space<vmem>>, vector<256x128xf32>,
    %c0_i32_9 = arith.constant 0 : i32
    %15 = arith.cmpi eq, %arg2, %c0_i32_9 : i32
    %16 = arith.extui %15 : i1 to i32
    %c0_i32_10 = arith.constant 0 : i32
    %17 = arith.cmpi ne, %16, %c0_i32_10 : i32
    scf.if %17 {
      %c256_i32_11 = arith.constant 256 : i32
      %18 = arith.muli %arg1, %c256_i32_11 : i32
      %19 = tpu.assume_multiple %18, 256 : i32
      %c0_12 = arith.constant 0 : index
      %c0_13 = arith.constant 0 : index
      %20 = vector.load %arg11[%c0_12, %c0_13] : memref<256x128xf32, #tpu.memory_space<vmem>>, vector<256x128xf32>
      %c1_i32 = arith.constant 1 : i32
      %21 = arith.cmpi ne, %arg0, %c1_i32 : i32
      %22 = arith.extui %21 : i1 to i32
      %c0_i32_14 = arith.constant 0 : i32
      %23 = arith.cmpi ne, %22, %c0_i32_14 : i32
      scf.if %23 {
        %45 = arith.index_cast %19 : i32 to index
        %c0_27 = arith.constant 0 : index
        %46 = vector.load %arg8[%45, %c0_27] : memref<256x128xf32, #tpu.memory_space<vmem>>, vector<256x128xf32>
        tpu.vector_store %arg8[%45, %c0_27], %20 {strides = array<i32>} : memref<256x128xf32, #tpu.memory_space<vmem>>, vector<256x128xf32>,
      } else {
      }
      %24 = arith.mulf %20, %20 : vector<256x128xf32>
      %cst_15 = arith.constant dense<0.000000e+00> : vector<256xf32>
      %25 = vector.multi_reduction <add>, %24, %cst_15 [1] : vector<256x128xf32> to vector<256xf32>
      %26 = vector.shape_cast %25 : vector<256xf32> to vector<256x1xf32>
      %cst_16 = arith.constant 1.000000e-24 : f32
      %27 = vector.broadcast %cst_16 : f32 to vector<256x1xf32>
      %28 = arith.maximumf %26, %27 : vector<256x1xf32>
      %29 = math.rsqrt %28 : vector<256x1xf32>
      %30 = vector.broadcast %29 : vector<256x1xf32> to vector<256x128xf32>
      %31 = arith.mulf %20, %30 : vector<256x128xf32>
      %c0_i32_17 = arith.constant 0 : i32
      %32 = arith.cmpi eq, %arg0, %c0_i32_17 : i32
      %33 = arith.extui %32 : i1 to i32
      %c0_i32_18 = arith.constant 0 : i32
      %34 = arith.cmpi ne, %33, %c0_i32_18 : i32
      scf.if %34 {
        %c0_27 = arith.constant 0 : index
        %c0_28 = arith.constant 0 : index
        %45 = vector.load %arg4[%c0_27, %c0_28] : memref<256x128xf32, #tpu.memory_space<vmem>>, vector<256x128xf32>
        %46 = arith.addf %45, %31 : vector<256x128xf32>
        %47 = arith.index_cast %19 : i32 to index
        %c0_29 = arith.constant 0 : index
        %48 = vector.load %arg10[%47, %c0_29] : memref<256x128xf32, #tpu.memory_space<vmem>>, vector<256x128xf32>
        tpu.vector_store %arg10[%47, %c0_29], %46 {strides = array<i32>} : memref<256x128xf32, #tpu.memory_space<vmem>>, vector<256x128xf32>,
      } else {
      }
      %c0_i32_19 = arith.constant 0 : i32
      %35 = arith.cmpi sgt, %arg0, %c0_i32_19 : i32
      %36 = arith.extui %35 : i1 to i32
      %c0_i32_20 = arith.constant 0 : i32
      %37 = arith.cmpi ne, %36, %c0_i32_20 : i32
      scf.if %37 {
        %45 = arith.index_cast %19 : i32 to index
        %c0_27 = arith.constant 0 : index
        %46 = vector.load %arg10[%45, %c0_27] : memref<256x128xf32, #tpu.memory_space<vmem>>, vector<256x128xf32>
        %47 = arith.addf %46, %31 : vector<256x128xf32>
        %48 = arith.index_cast %19 : i32 to index
        %c0_28 = arith.constant 0 : index
        %49 = vector.load %arg10[%48, %c0_28] : memref<256x128xf32, #tpu.memory_space<vmem>>, vector<256x128xf32>
        tpu.vector_store %arg10[%48, %c0_28], %47 {strides = array<i32>} : memref<256x128xf32, #tpu.memory_space<vmem>>, vector<256x128xf32>,
      } else {
      }
      %38 = arith.index_cast %19 : i32 to index
      %c0_21 = arith.constant 0 : index
      %39 = vector.load %arg10[%38, %c0_21] : memref<256x128xf32, #tpu.memory_space<vmem>>, vector<256x128xf32>
      %c1_i32_22 = arith.constant 1 : i32
      %40 = arith.cmpi eq, %arg0, %c1_i32_22 : i32
      %cst_23 = arith.constant 0.333333343 : f32
      %cst_24 = arith.constant 1.000000e+00 : f32
      %41 = arith.select %40, %cst_23, %cst_24 : f32
      %42 = vector.broadcast %41 : f32 to vector<256x128xf32>
      %43 = arith.mulf %39, %42 : vector<256x128xf32>
      %c0_25 = arith.constant 0 : index
      %c0_26 = arith.constant 0 : index
      %44 = vector.load %arg7[%c0_25, %c0_26] : memref<256x128xf32, #tpu.memory_space<vmem>>, vector<256x128xf32>
      tpu.vector_store %arg7[%c0_25, %c0_26], %43 {strides = array<i32>} : memref<256x128xf32, #tpu.memory_space<vmem>>, vector<256x128xf32>,
    } else {
    }
    return
  }
  func.func @transform_0(%arg0: i32, %arg1: i32, %arg2: i32) -> (i32, i32) {
    %c0_i32 = arith.constant 0 : i32
    %0 = arith.cmpi eq, %arg0, %c0_i32 : i32
    %c0_i32_0 = arith.constant 0 : i32
    %1 = arith.cmpi eq, %arg1, %c0_i32_0 : i32
    %2 = arith.andi %0, %1 : i1
    %c0_i32_1 = arith.constant 0 : i32
    %3 = arith.select %2, %arg2, %c0_i32_1 : i32
    %c0_i32_2 = arith.constant 0 : i32
    %c0_i32_3 = arith.constant 0 : i32
    return %3, %c0_i32_2 : i32, i32
  }
  func.func @transform_1(%arg0: i32, %arg1: i32, %arg2: i32) -> (i32, i32) {
    %c0_i32 = arith.constant 0 : i32
    %0 = arith.cmpi eq, %arg0, %c0_i32 : i32
    %c0_i32_0 = arith.constant 0 : i32
    %1 = arith.select %0, %arg1, %c0_i32_0 : i32
    %c0_i32_1 = arith.constant 0 : i32
    %c0_i32_2 = arith.constant 0 : i32
    return %1, %c0_i32_1 : i32, i32
  }
  func.func @transform_2(%arg0: i32, %arg1: i32, %arg2: i32) -> (i32, i32) {
    %c0_i32 = arith.constant 0 : i32
    return %arg1, %arg2 : i32, i32
  }
  func.func @transform_3(%arg0: i32, %arg1: i32, %arg2: i32) -> (i32, i32, i32) {
    %c0_i32 = arith.constant 0 : i32
    %c0_i32_0 = arith.constant 0 : i32
    %c0_i32_1 = arith.constant 0 : i32
    return %arg0, %c0_i32, %c0_i32_0 : i32, i32, i32
  }
  func.func @transform_4(%arg0: i32, %arg1: i32, %arg2: i32) -> (i32, i32) {
    %c0_i32 = arith.constant 0 : i32
    %c0_i32_0 = arith.constant 0 : i32
    return %arg1, %c0_i32 : i32, i32
  }
}

</mosaic_0001>

<bundles_post_ra>
// kernel: tpu_custom_call.1
= control target key start
LH: loop header
LB: loop body
LE: loop exit
PB: predicated region body
PF: predicated region fallthrough
CT: control target
= control target key end

     0   :  { %9 = vsyncpa [#allocation7], 0  ;;  %s4273_s0 = inlined_call_operand.hbm [shape: f32[256,128], index: 0, kind: input, shape index: {}]   ;;  %s4274_s1 = inlined_call_operand.hbm [shape: f32[256,128], index: 1, kind: input, shape index: {}]   ;;  %s4275_s2 = inlined_call_operand.hbm [shape: bf16[256,256], index: 2, kind: input, shape index: {}]   ;;  %s4276_s3 = inlined_call_operand.hbm [shape: f32[2,128,128], index: 3, kind: input, shape index: {}]   ;;  %s4277_s4 = inlined_call_operand.hbm [shape: f32[256,128], index: 4, kind: output, shape index: {}]  }
   0x1   :  { %11 = vsyncpa [#allocation7 + $0x1], 0 }
   0x2   :  { %12 = vsyncpa [#allocation10], 0 }
   0x3   :  { %14 = vsyncpa [#allocation10 + $0x1], 0 }
   0x4   :  { %15 = vsyncpa [#allocation13], 0 }
   0x5   :  { %17 = vsyncpa [#allocation13 + $0x1], 0 }
   0x6   :  { %18 = vsyncpa [#allocation8], 0  ;;  %s3473_s15 = smov 0   ;;  %s3475_s16 = smov 0  }
   0x7   :  { %s3477_s17 = smov 0   ;;  %s3479_s18 = smov 0  }
   0x8   :  { %s3481_s19 = smov 0   ;;  %s3483_s20 = smov 0  }
   0x9 LB: > { %s3502_s21 = sadd.s32 4294967295, %s3438_s20   ;;  %p157_p0 = scmp.ne.s32.totalorder %s3422_s16, %s3418_s15  ;;  %s3438_s20 = sphi %s3483_s20, %s24_s20   ;;  %s3434_s19 = sphi %s3481_s19, %s4284_s19   ;;  %s3430_s18 = sphi %s3479_s18, %s4283_s18   ;;  %s3426_s17 = sphi %s3477_s17, %s4282_s17   ;;  %s3422_s16 = sphi %s3475_s16, %s4281_s16   ;;  %s3418_s15 = sphi %s3473_s15, %s4280_s15  }
   0xa   : > { %p158_p1 = scmp.eq.s32.totalorder %s3502_s21, 0  ;;  %p2494_p2 = scmp.ge.s32.totalorder %s3438_s20, 1 }
   0xb   : > { %p194_p3 = scmp.lt.s32.totalorder %s3438_s20, 3  ;;  %s211_s25 = sshll.u32 %s4275_s2, 4  ;;  %s212_s25 = int_to_ptr.hbm [resolvable:$true] %s211_s25 }
   0xc   : > { %p3510_p4 = por %p158_p1, %p157_p0  ;;  %s3440_s27 = smov [#allocation11]  }
   0xd   : > { %p3517_p5 = pnand %p2494_p2, %p194_p3  ;;  %s213_s28 = sshll.u32 %s3440_s27, 4  ;;  %s214_s28 = int_to_ptr.vmem [resolvable:$true] %s213_s28 }
   0xe   : > { %p152_p8 = scmp.eq.s32.totalorder %s3438_s20, 0  ;;  %p3096_p9 = scmp.lt.s32.totalorder %s3438_s20, 2 }
   0xf   : > { %p3081_p6 = pneg %p3517_p5  ;;  %s3441_s29 = smov 128  }
  0x10   : > { %s3442_s30 = smov 8   ;;  %s242_s7 = sshll.u32 %s4273_s0, 4  ;;  %s243_s7 = int_to_ptr.hbm [resolvable:$true] %s242_s7 }
  0x11   : > { %p3082_p7 = pnand %p3081_p6, %p158_p1  ;;  %s3443_s8 = smov [#allocation6]  }
  0x12   : > { %s244_s9 = sshll.u32 %s3443_s8, 4  ;;  %p3086_p10 = pnand %p3096_p9, %p152_p8  ;;  %s245_s9 = int_to_ptr.vmem [resolvable:$true] %s244_s9 }
  0x13   : > { %3084 = dma.hbm_to_vmem [thread:$0]  (!%p3082_p7), %s212_s25, 4096, %s214_s28, [#allocation10], %s3441_s29, %s3441_s29, %s3442_s30  }
  0x14   : > { %s254_s10 = sand.u32 1, %s3438_s20   ;;  %s266_s13 = sshll.u32 %s4274_s1, 4  ;;  %s267_s13 = int_to_ptr.hbm [resolvable:$true] %s266_s13 }
  0x15   : > { %3088 = dma.hbm_to_vmem [thread:$0]  (!%p3086_p10), %s243_s7, 4096, %s245_s9, [#allocation7], %s3441_s29, %s3441_s29, %s3442_s30  }
  0x16   : > { %s3444_s14 = smov [#allocation9]   ;;  %s255_s23 = scalar_lea.sflag [#allocation10], %s254_s10 }
  0x17   : > { %s268_s15 = sshll.u32 %s3444_s14, 4  ;;  %s43_s24 = sadd.s32 1, %s3434_s19  ;;  %s269_s15 = int_to_ptr.vmem [resolvable:$true] %s268_s15 }
  0x18   : > { %3091 = dma.hbm_to_vmem [thread:$0]  (!%p3086_p10), %s267_s13, 4096, %s269_s15, %s255_s23, %s3441_s29, %s3441_s29, %s3442_s30  }
  0x19   : > { %s144_s25 = sadd.s32 1, %s3426_s17  ;;  %p45_p11 = scmp.ge.s32.totalorder %s43_s24, 2 }
  0x1a   : > { %p151_p12 = scmp.ne.s32.totalorder %s3426_s17, %s3422_s16  ;;  %s278_s27 = sand.u32 1, %s3426_s17  }
  0x1b   : > { %s2712_s28 = sshll.u32 %s3434_s19, 7  ;;  %s4286_s24 = smov (%p45_p11, %s43_s24), 0 }
  0x1c   : > { %p153_p13 = por %p152_p8, %p151_p12  ;;  %s141_s5 = ssub.s32 %s3434_s19, %s4286_s24 }
  0x1d   : > { %s2500_s6 = sshll.u32 %s278_s27, 7  ;;  %p142_p0 = scmp.eq.s32.totalorder %s141_s5, 0 }
  0x1e   : > { %s287_s9 = scalar_lea.hbm %s4276_s3, %s2712_s28  ;;  %s282_s10 = scalar_lea.vmem [#allocation12], %s2500_s6 }
  0x1f   : > { %s290_s11 = sshll.u32 %s282_s10, 4  ;;  %s288_s13 = sshll.u32 %s287_s9, 4  ;;  %s291_s11 = int_to_ptr.vmem [resolvable:$true] %s290_s11  ;;  %s289_s13 = int_to_ptr.hbm [resolvable:$true] %s288_s13 }
  0x20   : > { %s3563_s12 = scalar_select %p142_p0, %s3426_s17, %s144_s25  }
  0x21   : > { %p3092_p2 = pnand %p3096_p9, %p153_p13  ;;  %s279_s14 = scalar_lea.sflag [#allocation13], %s278_s27 }
  0x22   : > { %302 = sbr.rel (%p3517_p5) target bundleno = 1174 (0x496), region = 36 }
  0x23   : > { %3094 = dma.hbm_to_vmem [thread:$0]  (!%p3092_p2), %s289_s13, 2048, %s291_s11, %s279_s14, %s3441_s29, %s3441_s29, %s3442_s30  }
  0x27   : > { %3397 = dma.done.wait (%p158_p1), [#allocation7], 4096  }
  0x28   : > { %3399 = vsyncadd (%p158_p1), [#allocation7], 4294963200  ;;  %s314_s15 = sand.u32 1, %s3502_s21  }
  0x29   : > { %s315_s23 = scalar_lea.sflag [#allocation10], %s314_s15 }
  0x2a   : > { %3401 = dma.done.wait (%p158_p1), %s315_s23, 4096  }
  0x2b   : > { %3403 = vsyncadd (%p158_p1), %s315_s23, 4294963200 }
  0x2c   : > { %3405 = dma.done.wait (%p158_p1), [#allocation10], 4096  }
  0x2d   : > { %3407 = vsyncadd (%p158_p1), [#allocation10], 4294963200  ;;  %s329_s26 = sand.u32 1, %s3422_s16  }
  0x2e   : > { %s2507_s29 = sshll.u32 %s329_s26, 7  ;;  %s330_s30 = scalar_lea.sflag [#allocation13], %s329_s26 }
  0x2f   : > { %s3586_s25 = scalar_lea.vmem [#allocation12], %s2507_s29 }
  0x30   : > { %3409 = dma.done.wait (%p3510_p4), %s330_s30, 2048  }
  0x31   : > { %3411 = vsyncadd (%p3510_p4), %s330_s30, 4294965248  ;;  %p2508_p3 = scmp.ne.s32.totalorder %s3430_s18, 0 }
  0x33   : > { %384 = sbr.rel (%p2508_p3) target bundleno = 282 (0x11a), region = 60 }
  0x38   : > { %v432_v0 = vld [vmem:[%s3586_s25 + $0x78] sm:$0xff]  ;;  %v431_v1 = vld [vmem:[%s3586_s25 + $0x70] sm:$0xff]  ;;  %v430_v2 = vld [vmem:[%s3586_s25 + $0x68] sm:$0xff] }
  0x39   : > { %433 = vmatpush.msra.mxu0 %v432_v0  ;;  %2951 = vmatpush.msra.mxu1 %v432_v0  ;;  %v429_v3 = vld [vmem:[%s3586_s25 + $0x60] sm:$0xff]  ;;  %v428_v4 = vld [vmem:[%s3586_s25 + $0x58] sm:$0xff]  ;;  %v427_v5 = vld [vmem:[%s3586_s25 + $0x50] sm:$0xff] }
  0x3a   : > { %2952 = vmatpush.msra.mxu2 %v432_v0  ;;  %2953 = vmatpush.msra.mxu3 %v432_v0  ;;  %v426_v6 = vld [vmem:[%s3586_s25 + $0x48] sm:$0xff]  ;;  %v425_v7 = vld [vmem:[%s3586_s25 + $0x40] sm:$0xff]  ;;  %v424_v8 = vld [vmem:[%s3586_s25 + $0x38] sm:$0xff] }
  0x3b   : > { %434 = vmatpush.msra.mxu0 %v431_v1  ;;  %2954 = vmatpush.msra.mxu1 %v431_v1  ;;  %v423_v9 = vld [vmem:[%s3586_s25 + $0x30] sm:$0xff]  ;;  %v422_v10 = vld [vmem:[%s3586_s25 + $0x28] sm:$0xff]  ;;  %v421_v11 = vld [vmem:[%s3586_s25 + $0x20] sm:$0xff] }
  0x3c   : > { %2955 = vmatpush.msra.mxu2 %v431_v1  ;;  %2956 = vmatpush.msra.mxu3 %v431_v1  ;;  %v420_v12 = vld [vmem:[%s3586_s25 + $0x18] sm:$0xff]  ;;  %v419_v13 = vld [vmem:[%s3586_s25 + $0x10] sm:$0xff]  ;;  %v418_v14 = vld [vmem:[%s3586_s25 + $0x8] sm:$0xff] }
  0x3d   : > { %435 = vmatpush.msra.mxu0 %v430_v2  ;;  %2957 = vmatpush.msra.mxu1 %v430_v2  ;;  %v417_v15 = vld [vmem:[%s3586_s25] sm:$0xff]  ;;  %v386_v20 = vld [vmem:[#allocation6 + $0x8] sm:$0xff]  ;;  %v387_v24 = vld [vmem:[#allocation6 + $0x10] sm:$0xff] }
  0x3e   : > { %2958 = vmatpush.msra.mxu2 %v430_v2  ;;  %2959 = vmatpush.msra.mxu3 %v430_v2  ;;  %v385_v16 = vld [vmem:[#allocation6] sm:$0xff]  ;;  %v394_v21 = vld [vmem:[#allocation6 + $0x48] sm:$0xff]  ;;  %v395_v25 = vld [vmem:[#allocation6 + $0x50] sm:$0xff] }
  0x3f   : > { %436 = vmatpush.msra.mxu0 %v429_v3  ;;  %2960 = vmatpush.msra.mxu1 %v429_v3  ;;  %v393_v17 = vld [vmem:[#allocation6 + $0x40] sm:$0xff]  ;;  %v402_v22 = vld [vmem:[#allocation6 + $0x88] sm:$0xff]  ;;  %v403_v26 = vld [vmem:[#allocation6 + $0x90] sm:$0xff] }
  0x40   : > { %2961 = vmatpush.msra.mxu2 %v429_v3  ;;  %2962 = vmatpush.msra.mxu3 %v429_v3  ;;  %v401_v18 = vld [vmem:[#allocation6 + $0x80] sm:$0xff]  ;;  %v410_v23 = vld [vmem:[#allocation6 + $0xc8] sm:$0xff]  ;;  %v411_v27 = vld [vmem:[#allocation6 + $0xd0] sm:$0xff] }
  0x41   : > { %437 = vmatpush.msra.mxu0 %v428_v4  ;;  %2963 = vmatpush.msra.mxu1 %v428_v4  ;;  %v409_v19 = vld [vmem:[#allocation6 + $0xc0] sm:$0xff]  ;;  %v388_v28 = vld [vmem:[#allocation6 + $0x18] sm:$0xff]  ;;  %v390_v36 = vld [vmem:[#allocation6 + $0x28] sm:$0xff] }
  0x42   : > { %2964 = vmatpush.msra.mxu2 %v428_v4  ;;  %2965 = vmatpush.msra.mxu3 %v428_v4  ;;  %v396_v29 = vld [vmem:[#allocation6 + $0x58] sm:$0xff]  ;;  %v389_v32 = vld [vmem:[#allocation6 + $0x20] sm:$0xff]  ;;  %v398_v37 = vld [vmem:[#allocation6 + $0x68] sm:$0xff] }
  0x43   : > { %438 = vmatpush.msra.mxu0 %v427_v5  ;;  %2966 = vmatpush.msra.mxu1 %v427_v5  ;;  %v404_v30 = vld [vmem:[#allocation6 + $0x98] sm:$0xff]  ;;  %v397_v33 = vld [vmem:[#allocation6 + $0x60] sm:$0xff]  ;;  %v406_v38 = vld [vmem:[#allocation6 + $0xa8] sm:$0xff] }
  0x44   : > { %2967 = vmatpush.msra.mxu2 %v427_v5  ;;  %2968 = vmatpush.msra.mxu3 %v427_v5  ;;  %v412_v31 = vld [vmem:[#allocation6 + $0xd8] sm:$0xff]  ;;  %v405_v34 = vld [vmem:[#allocation6 + $0xa0] sm:$0xff]  ;;  %v414_v39 = vld [vmem:[#allocation6 + $0xe8] sm:$0xff] }
  0x45   : > { %439 = vmatpush.msra.mxu0 %v426_v6  ;;  %2969 = vmatpush.msra.mxu1 %v426_v6  ;;  %v413_v35 = vld [vmem:[#allocation6 + $0xe0] sm:$0xff]  ;;  %v391_v40 = vld [vmem:[#allocation6 + $0x30] sm:$0xff]  ;;  %v392_v44 = vld [vmem:[#allocation6 + $0x38] sm:$0xff] }
  0x46   : > { %2970 = vmatpush.msra.mxu2 %v426_v6  ;;  %2971 = vmatpush.msra.mxu3 %v426_v6  ;;  %v399_v41 = vld [vmem:[#allocation6 + $0x70] sm:$0xff]  ;;  %v400_v45 = vld [vmem:[#allocation6 + $0x78] sm:$0xff] }
  0x47   : > { %440 = vmatpush.msra.mxu0 %v425_v7  ;;  %2972 = vmatpush.msra.mxu1 %v425_v7  ;;  %v407_v42 = vld [vmem:[#allocation6 + $0xb0] sm:$0xff]  ;;  %v408_v46 = vld [vmem:[#allocation6 + $0xb8] sm:$0xff] }
  0x48   : > { %2973 = vmatpush.msra.mxu2 %v425_v7  ;;  %2974 = vmatpush.msra.mxu3 %v425_v7  ;;  %v415_v43 = vld [vmem:[#allocation6 + $0xf0] sm:$0xff]  ;;  %v416_v47 = vld [vmem:[#allocation6 + $0xf8] sm:$0xff] }
  0x49   : > { %441 = vmatpush.msra.mxu0 %v424_v8  ;;  %2975 = vmatpush.msra.mxu1 %v424_v8 }
  0x4a   : > { %2976 = vmatpush.msra.mxu2 %v424_v8  ;;  %2977 = vmatpush.msra.mxu3 %v424_v8 }
  0x4b   : > { %442 = vmatpush.msra.mxu0 %v423_v9  ;;  %2978 = vmatpush.msra.mxu1 %v423_v9 }
  0x4c   : > { %2979 = vmatpush.msra.mxu2 %v423_v9  ;;  %2980 = vmatpush.msra.mxu3 %v423_v9 }
  0x4d   : > { %443 = vmatpush.msra.mxu0 %v422_v10  ;;  %2981 = vmatpush.msra.mxu1 %v422_v10 }
  0x4e   : > { %2982 = vmatpush.msra.mxu2 %v422_v10  ;;  %2983 = vmatpush.msra.mxu3 %v422_v10 }
  0x4f   : > { %444 = vmatpush.msra.mxu0 %v421_v11  ;;  %2984 = vmatpush.msra.mxu1 %v421_v11 }
  0x50   : > { %2985 = vmatpush.msra.mxu2 %v421_v11  ;;  %2986 = vmatpush.msra.mxu3 %v421_v11 }
  0x51   : > { %445 = vmatpush.msra.mxu0 %v420_v12  ;;  %2987 = vmatpush.msra.mxu1 %v420_v12 }
  0x52   : > { %2988 = vmatpush.msra.mxu2 %v420_v12  ;;  %2989 = vmatpush.msra.mxu3 %v420_v12 }
  0x53   : > { %446 = vmatpush.msra.mxu0 %v419_v13  ;;  %2990 = vmatpush.msra.mxu1 %v419_v13 }
  0x54   : > { %2991 = vmatpush.msra.mxu2 %v419_v13  ;;  %2992 = vmatpush.msra.mxu3 %v419_v13 }
  0x55   : > { %447 = vmatpush.msra.mxu0 %v418_v14  ;;  %2993 = vmatpush.msra.mxu1 %v418_v14 }
  0x56   : > { %2994 = vmatpush.msra.mxu2 %v418_v14  ;;  %2995 = vmatpush.msra.mxu3 %v418_v14 }
  0x57   : > { %448 = vmatpush.msra.mxu0 %v417_v15  ;;  %2996 = vmatpush.msra.mxu1 %v417_v15 }
  0x58   : > { %2997 = vmatpush.msra.mxu2 %v417_v15  ;;  %2998 = vmatpush.msra.mxu3 %v417_v15 }
  0x59   : > { %449 = vmatmul.f32.vlgmr.msra.gmra.mxu0 %v385_v16  ;;  %473 = vmatmul.f32.vlgmr.msra.gmra.mxu1 %v393_v17 }
  0x5a   : > { %497 = vmatmul.f32.vlgmr.msra.gmra.mxu2 %v401_v18  ;;  %521 = vmatmul.f32.vlgmr.msra.gmra.mxu3 %v409_v19 }
  0x61   : > { %452 = vmatmul.f32.gmra.mxu0 %v386_v20  ;;  %476 = vmatmul.f32.gmra.mxu1 %v394_v21 }
  0x62   : > { %500 = vmatmul.f32.gmra.mxu2 %v402_v22  ;;  %524 = vmatmul.f32.gmra.mxu3 %v410_v23 }
  0x69   : > { %455 = vmatmul.f32.gmra.mxu0 %v387_v24  ;;  %479 = vmatmul.f32.gmra.mxu1 %v395_v25 }
  0x6a   : > { %503 = vmatmul.f32.gmra.mxu2 %v403_v26  ;;  %527 = vmatmul.f32.gmra.mxu3 %v411_v27 }
  0x71   : > { %458 = vmatmul.f32.gmra.mxu0 %v388_v28  ;;  %482 = vmatmul.f32.gmra.mxu1 %v396_v29 }
  0x72   : > { %506 = vmatmul.f32.gmra.mxu2 %v404_v30  ;;  %530 = vmatmul.f32.gmra.mxu3 %v412_v31 }
  0x79   : > { %461 = vmatmul.f32.gmra.mxu0 %v389_v32  ;;  %485 = vmatmul.f32.gmra.mxu1 %v397_v33 }
  0x7a   : > { %509 = vmatmul.f32.gmra.mxu2 %v405_v34  ;;  %533 = vmatmul.f32.gmra.mxu3 %v413_v35 }
  0x81   : > { %464 = vmatmul.f32.gmra.mxu0 %v390_v36  ;;  %488 = vmatmul.f32.gmra.mxu1 %v398_v37 }
  0x82   : > { %512 = vmatmul.f32.gmra.mxu2 %v406_v38  ;;  %536 = vmatmul.f32.gmra.mxu3 %v414_v39 }
  0x89   : > { %467 = vmatmul.f32.gmra.mxu0 %v391_v40  ;;  %491 = vmatmul.f32.gmra.mxu1 %v399_v41 }
  0x8a   : > { %515 = vmatmul.f32.gmra.mxu2 %v407_v42  ;;  %539 = vmatmul.f32.gmra.mxu3 %v415_v43 }
  0x91   : > { %470 = vmatmul.f32.gmra.mxu0 %v392_v44  ;;  %494 = vmatmul.f32.gmra.mxu1 %v400_v45 }
  0x92   : > { %518 = vmatmul.f32.gmra.mxu2 %v408_v46  ;;  %542 = vmatmul.f32.gmra.mxu3 %v416_v47 }
  0xd6   : > { %v450_v48 = vpop.f32.mrf.mxu0  ;;  %v474_v49 = vpop.f32.mrf.mxu1 }
  0xdd   : > { %v498_v50 = vpop.f32.mrf.mxu2  ;;  %v522_v51 = vpop.f32.mrf.mxu3 }
  0xde   : > { %v453_v52 = vpop.f32.mrf.mxu0  ;;  %v477_v53 = vpop.f32.mrf.mxu1 }
  0xdf   : > { %v2764_v54 = vpack.c.bf16 %v453_v52, %v450_v48  ;;  %v2784_v55 = vpack.c.bf16 %v477_v53, %v474_v49 }
  0xe1   : > { %2765 = vst [vmem:[#allocation3] sm:$0xff] %v2764_v54  }
  0xe2   : > { %2924 = vst [vmem:[#allocation3 + $0x8] sm:$0xff] %v2784_v55  }
  0xe5   : > { %v501_v56 = vpop.f32.mrf.mxu2  ;;  %v525_v57 = vpop.f32.mrf.mxu3 }
  0xe6   : > { %v2804_v58 = vpack.c.bf16 %v501_v56, %v498_v50  ;;  %v2824_v59 = vpack.c.bf16 %v525_v57, %v522_v51  ;;  %v456_v60 = vpop.f32.mrf.mxu0  ;;  %v480_v61 = vpop.f32.mrf.mxu1 }
  0xe8   : > { %2928 = vst [vmem:[#allocation3 + $0x70] sm:$0xff] %v2804_v58  }
  0xe9   : > { %2932 = vst [vmem:[#allocation3 + $0x10] sm:$0xff] %v2824_v59  }
  0xed   : > { %v504_v62 = vpop.f32.mrf.mxu2  ;;  %v528_v63 = vpop.f32.mrf.mxu3 }
  0xee   : > { %v459_v0 = vpop.f32.mrf.mxu0  ;;  %v483_v1 = vpop.f32.mrf.mxu1 }
  0xef   : > { %v2769_v2 = vpack.c.bf16 %v459_v0, %v456_v60  ;;  %v2789_v3 = vpack.c.bf16 %v483_v1, %v480_v61 }
  0xf1   : > { %2921 = vst [vmem:[#allocation3 + $0x48] sm:$0xff] %v2769_v2  }
  0xf2   : > { %2925 = vst [vmem:[#allocation3 + $0x50] sm:$0xff] %v2789_v3  }
  0xf5   : > { %v507_v4 = vpop.f32.mrf.mxu2  ;;  %v531_v5 = vpop.f32.mrf.mxu3 }
  0xf6   : > { %v2809_v6 = vpack.c.bf16 %v507_v4, %v504_v62  ;;  %v2829_v7 = vpack.c.bf16 %v531_v5, %v528_v63  ;;  %v462_v8 = vpop.f32.mrf.mxu0  ;;  %v486_v9 = vpop.f32.mrf.mxu1 }
  0xf8   : > { %2929 = vst [vmem:[#allocation3 + $0x60] sm:$0xff] %v2809_v6  }
  0xf9   : > { %2933 = vst [vmem:[#allocation3 + $0x30] sm:$0xff] %v2829_v7  }
  0xfd   : > { %v510_v10 = vpop.f32.mrf.mxu2  ;;  %v534_v11 = vpop.f32.mrf.mxu3 }
  0xfe   : > { %v465_v12 = vpop.f32.mrf.mxu0  ;;  %v489_v13 = vpop.f32.mrf.mxu1 }
  0xff   : > { %v2774_v14 = vpack.c.bf16 %v465_v12, %v462_v8  ;;  %v2794_v15 = vpack.c.bf16 %v489_v13, %v486_v9 }
 0x101   : > { %2922 = vst [vmem:[#allocation3 + $0x68] sm:$0xff] %v2774_v14  }
 0x102   : > { %2926 = vst [vmem:[#allocation3 + $0x40] sm:$0xff] %v2794_v15  }
 0x105   : > { %v513_v16 = vpop.f32.mrf.mxu2  ;;  %v537_v17 = vpop.f32.mrf.mxu3 }
 0x106   : > { %v2814_v18 = vpack.c.bf16 %v513_v16, %v510_v10  ;;  %v2834_v19 = vpack.c.bf16 %v537_v17, %v534_v11  ;;  %v468_v20 = vpop.f32.mrf.mxu0  ;;  %v492_v21 = vpop.f32.mrf.mxu1 }
 0x108   : > { %2930 = vst [vmem:[#allocation3 + $0x18] sm:$0xff] %v2814_v18  }
 0x109   : > { %2934 = vst [vmem:[#allocation3 + $0x28] sm:$0xff] %v2834_v19  }
 0x10d   : > { %v516_v22 = vpop.f32.mrf.mxu2  ;;  %v540_v23 = vpop.f32.mrf.mxu3 }
 0x10e   : > { %v471_v24 = vpop.f32.mrf.mxu0  ;;  %v495_v25 = vpop.f32.mrf.mxu1 }
 0x10f   : > { %v2779_v26 = vpack.c.bf16 %v471_v24, %v468_v20  ;;  %v2799_v27 = vpack.c.bf16 %v495_v25, %v492_v21 }
 0x111   : > { %2923 = vst [vmem:[#allocation3 + $0x78] sm:$0xff] %v2779_v26  }
 0x112   : > { %2927 = vst [vmem:[#allocation3 + $0x38] sm:$0xff] %v2799_v27  }
 0x115   : > { %v519_v28 = vpop.f32.mrf.mxu2  ;;  %v543_v29 = vpop.f32.mrf.mxu3 }
 0x116   : > { %v2819_v30 = vpack.c.bf16 %v519_v28, %v516_v22  ;;  %v2839_v31 = vpack.c.bf16 %v543_v29, %v540_v23 }
 0x118   : > { %2931 = vst [vmem:[#allocation3 + $0x20] sm:$0xff] %v2819_v30  }
 0x119   : > { %2935 = vst [vmem:[#allocation3 + $0x58] sm:$0xff] %v2839_v31  }
 0x11a PF: > { %p2509_p1 = scmp.le.s32.totalorder %s3430_s18, 0 }
 0x11c   : > { %617 = sbr.rel (%p2509_p1) target bundleno = 515 (0x203), region = 64 }
 0x121   : > { %v666_v32 = vld [vmem:[%s3586_s25 + $0x78] sm:$0xff]  ;;  %v665_v33 = vld [vmem:[%s3586_s25 + $0x70] sm:$0xff]  ;;  %v664_v34 = vld [vmem:[%s3586_s25 + $0x68] sm:$0xff] }
 0x122   : > { %667 = vmatpush.msra.mxu0 %v666_v32  ;;  %2999 = vmatpush.msra.mxu1 %v666_v32  ;;  %v663_v35 = vld [vmem:[%s3586_s25 + $0x60] sm:$0xff]  ;;  %v662_v36 = vld [vmem:[%s3586_s25 + $0x58] sm:$0xff]  ;;  %v661_v37 = vld [vmem:[%s3586_s25 + $0x50] sm:$0xff] }
 0x123   : > { %3000 = vmatpush.msra.mxu2 %v666_v32  ;;  %3001 = vmatpush.msra.mxu3 %v666_v32  ;;  %v660_v38 = vld [vmem:[%s3586_s25 + $0x48] sm:$0xff]  ;;  %v659_v39 = vld [vmem:[%s3586_s25 + $0x40] sm:$0xff]  ;;  %v658_v40 = vld [vmem:[%s3586_s25 + $0x38] sm:$0xff] }
 0x124   : > { %668 = vmatpush.msra.mxu0 %v665_v33  ;;  %3002 = vmatpush.msra.mxu1 %v665_v33  ;;  %v657_v41 = vld [vmem:[%s3586_s25 + $0x30] sm:$0xff]  ;;  %v656_v42 = vld [vmem:[%s3586_s25 + $0x28] sm:$0xff]  ;;  %v655_v43 = vld [vmem:[%s3586_s25 + $0x20] sm:$0xff] }
 0x125   : > { %3003 = vmatpush.msra.mxu2 %v665_v33  ;;  %3004 = vmatpush.msra.mxu3 %v665_v33  ;;  %v654_v44 = vld [vmem:[%s3586_s25 + $0x18] sm:$0xff]  ;;  %v653_v45 = vld [vmem:[%s3586_s25 + $0x10] sm:$0xff]  ;;  %v652_v46 = vld [vmem:[%s3586_s25 + $0x8] sm:$0xff] }
 0x126   : > { %669 = vmatpush.msra.mxu0 %v664_v34  ;;  %3005 = vmatpush.msra.mxu1 %v664_v34  ;;  %v651_v47 = vld [vmem:[%s3586_s25] sm:$0xff]  ;;  %v619_v48 = vld [vmem:[#allocation2 + $0xb0] sm:$0xff]  ;;  %v635_v50 = vld [vmem:[#allocation2 + $0x38] sm:$0xff] }
 0x127   : > { %3006 = vmatpush.msra.mxu2 %v664_v34  ;;  %3007 = vmatpush.msra.mxu3 %v664_v34  ;;  %v627_v49 = vld [vmem:[#allocation2 + $0x80] sm:$0xff]  ;;  %v643_v51 = vld [vmem:[#allocation2 + $0xa8] sm:$0xff]  ;;  %v636_v54 = vld [vmem:[#allocation2 + $0x58] sm:$0xff] }
 0x128   : > { %670 = vmatpush.msra.mxu0 %v663_v35  ;;  %3008 = vmatpush.msra.mxu1 %v663_v35  ;;  %v620_v52 = vld [vmem:[#allocation2] sm:$0xff]  ;;  %v628_v53 = vld [vmem:[#allocation2 + $0x88] sm:$0xff]  ;;  %v644_v55 = vld [vmem:[#allocation2 + $0xd0] sm:$0xff] }
 0x129   : > { %3009 = vmatpush.msra.mxu2 %v663_v35  ;;  %3010 = vmatpush.msra.mxu3 %v663_v35  ;;  %v621_v56 = vld [vmem:[#allocation2 + $0xd8] sm:$0xff]  ;;  %v629_v57 = vld [vmem:[#allocation2 + $0xe8] sm:$0xff]  ;;  %v637_v58 = vld [vmem:[#allocation2 + $0x40] sm:$0xff] }
 0x12a   : > { %671 = vmatpush.msra.mxu0 %v662_v36  ;;  %3011 = vmatpush.msra.mxu1 %v662_v36  ;;  %v645_v59 = vld [vmem:[#allocation2 + $0x10] sm:$0xff]  ;;  %v622_v60 = vld [vmem:[#allocation2 + $0x18] sm:$0xff]  ;;  %v638_v62 = vld [vmem:[#allocation2 + $0xc8] sm:$0xff] }
 0x12b   : > { %3012 = vmatpush.msra.mxu2 %v662_v36  ;;  %3013 = vmatpush.msra.mxu3 %v662_v36  ;;  %v630_v61 = vld [vmem:[#allocation2 + $0xb8] sm:$0xff]  ;;  %v646_v63 = vld [vmem:[#allocation2 + $0x28] sm:$0xff]  ;;  %v623_v0 = vld [vmem:[#allocation2 + $0x50] sm:$0xff] }
 0x12c   : > { %672 = vmatpush.msra.mxu0 %v661_v37  ;;  %3014 = vmatpush.msra.mxu1 %v661_v37  ;;  %v631_v1 = vld [vmem:[#allocation2 + $0x60] sm:$0xff]  ;;  %v624_v4 = vld [vmem:[#allocation2 + $0x68] sm:$0xff]  ;;  %v632_v5 = vld [vmem:[#allocation2 + $0xf0] sm:$0xff] }
 0x12d   : > { %3015 = vmatpush.msra.mxu2 %v661_v37  ;;  %3016 = vmatpush.msra.mxu3 %v661_v37  ;;  %v639_v2 = vld [vmem:[#allocation2 + $0xe0] sm:$0xff]  ;;  %v640_v6 = vld [vmem:[#allocation2 + $0x90] sm:$0xff]  ;;  %v648_v7 = vld [vmem:[#allocation2 + $0xf8] sm:$0xff] }
 0x12e   : > { %673 = vmatpush.msra.mxu0 %v660_v38  ;;  %3017 = vmatpush.msra.mxu1 %v660_v38  ;;  %v647_v3 = vld [vmem:[#allocation2 + $0xa0] sm:$0xff]  ;;  %v625_v8 = vld [vmem:[#allocation2 + $0x30] sm:$0xff]  ;;  %v633_v9 = vld [vmem:[#allocation2 + $0x8] sm:$0xff] }
 0x12f   : > { %3018 = vmatpush.msra.mxu2 %v660_v38  ;;  %3019 = vmatpush.msra.mxu3 %v660_v38  ;;  %v641_v10 = vld [vmem:[#allocation2 + $0x70] sm:$0xff]  ;;  %v649_v11 = vld [vmem:[#allocation2 + $0x20] sm:$0xff]  ;;  %v626_v12 = vld [vmem:[#allocation2 + $0x48] sm:$0xff] }
 0x130   : > { %674 = vmatpush.msra.mxu0 %v659_v39  ;;  %3020 = vmatpush.msra.mxu1 %v659_v39  ;;  %v634_v13 = vld [vmem:[#allocation2 + $0x78] sm:$0xff]  ;;  %v642_v14 = vld [vmem:[#allocation2 + $0xc0] sm:$0xff] }
 0x131   : > { %3021 = vmatpush.msra.mxu2 %v659_v39  ;;  %3022 = vmatpush.msra.mxu3 %v659_v39  ;;  %v650_v15 = vld [vmem:[#allocation2 + $0x98] sm:$0xff] }
 0x132   : > { %675 = vmatpush.msra.mxu0 %v658_v40  ;;  %3023 = vmatpush.msra.mxu1 %v658_v40 }
 0x133   : > { %3024 = vmatpush.msra.mxu2 %v658_v40  ;;  %3025 = vmatpush.msra.mxu3 %v658_v40 }
 0x134   : > { %676 = vmatpush.msra.mxu0 %v657_v41  ;;  %3026 = vmatpush.msra.mxu1 %v657_v41 }
 0x135   : > { %3027 = vmatpush.msra.mxu2 %v657_v41  ;;  %3028 = vmatpush.msra.mxu3 %v657_v41 }
 0x136   : > { %677 = vmatpush.msra.mxu0 %v656_v42  ;;  %3029 = vmatpush.msra.mxu1 %v656_v42 }
 0x137   : > { %3030 = vmatpush.msra.mxu2 %v656_v42  ;;  %3031 = vmatpush.msra.mxu3 %v656_v42 }
 0x138   : > { %678 = vmatpush.msra.mxu0 %v655_v43  ;;  %3032 = vmatpush.msra.mxu1 %v655_v43 }
 0x139   : > { %3033 = vmatpush.msra.mxu2 %v655_v43  ;;  %3034 = vmatpush.msra.mxu3 %v655_v43 }
 0x13a   : > { %679 = vmatpush.msra.mxu0 %v654_v44  ;;  %3035 = vmatpush.msra.mxu1 %v654_v44 }
 0x13b   : > { %3036 = vmatpush.msra.mxu2 %v654_v44  ;;  %3037 = vmatpush.msra.mxu3 %v654_v44 }
 0x13c   : > { %680 = vmatpush.msra.mxu0 %v653_v45  ;;  %3038 = vmatpush.msra.mxu1 %v653_v45 }
 0x13d   : > { %3039 = vmatpush.msra.mxu2 %v653_v45  ;;  %3040 = vmatpush.msra.mxu3 %v653_v45 }
 0x13e   : > { %681 = vmatpush.msra.mxu0 %v652_v46  ;;  %3041 = vmatpush.msra.mxu1 %v652_v46 }
 0x13f   : > { %3042 = vmatpush.msra.mxu2 %v652_v46  ;;  %3043 = vmatpush.msra.mxu3 %v652_v46 }
 0x140   : > { %682 = vmatpush.msra.mxu0 %v651_v47  ;;  %3044 = vmatpush.msra.mxu1 %v651_v47 }
 0x141   : > { %3045 = vmatpush.msra.mxu2 %v651_v47  ;;  %3046 = vmatpush.msra.mxu3 %v651_v47 }
 0x142   : > { %683 = vmatmul.f32.vlgmr.msra.gmra.mxu0 %v619_v48  ;;  %707 = vmatmul.f32.vlgmr.msra.gmra.mxu1 %v627_v49 }
 0x143   : > { %731 = vmatmul.f32.vlgmr.msra.gmra.mxu2 %v635_v50  ;;  %755 = vmatmul.f32.vlgmr.msra.gmra.mxu3 %v643_v51 }
 0x14a   : > { %686 = vmatmul.f32.gmra.mxu0 %v620_v52  ;;  %710 = vmatmul.f32.gmra.mxu1 %v628_v53 }
 0x14b   : > { %734 = vmatmul.f32.gmra.mxu2 %v636_v54  ;;  %758 = vmatmul.f32.gmra.mxu3 %v644_v55 }
 0x152   : > { %689 = vmatmul.f32.gmra.mxu0 %v621_v56  ;;  %713 = vmatmul.f32.gmra.mxu1 %v629_v57 }
 0x153   : > { %737 = vmatmul.f32.gmra.mxu2 %v637_v58  ;;  %761 = vmatmul.f32.gmra.mxu3 %v645_v59 }
 0x15a   : > { %692 = vmatmul.f32.gmra.mxu0 %v622_v60  ;;  %716 = vmatmul.f32.gmra.mxu1 %v630_v61 }
 0x15b   : > { %740 = vmatmul.f32.gmra.mxu2 %v638_v62  ;;  %764 = vmatmul.f32.gmra.mxu3 %v646_v63 }
 0x162   : > { %695 = vmatmul.f32.gmra.mxu0 %v623_v0  ;;  %719 = vmatmul.f32.gmra.mxu1 %v631_v1 }
 0x163   : > { %743 = vmatmul.f32.gmra.mxu2 %v639_v2  ;;  %767 = vmatmul.f32.gmra.mxu3 %v647_v3 }
 0x16a   : > { %698 = vmatmul.f32.gmra.mxu0 %v624_v4  ;;  %722 = vmatmul.f32.gmra.mxu1 %v632_v5 }
 0x16b   : > { %746 = vmatmul.f32.gmra.mxu2 %v640_v6  ;;  %770 = vmatmul.f32.gmra.mxu3 %v648_v7 }
 0x172   : > { %701 = vmatmul.f32.gmra.mxu0 %v625_v8  ;;  %725 = vmatmul.f32.gmra.mxu1 %v633_v9 }
 0x173   : > { %749 = vmatmul.f32.gmra.mxu2 %v641_v10  ;;  %773 = vmatmul.f32.gmra.mxu3 %v649_v11 }
 0x17a   : > { %704 = vmatmul.f32.gmra.mxu0 %v626_v12  ;;  %728 = vmatmul.f32.gmra.mxu1 %v634_v13 }
 0x17b   : > { %752 = vmatmul.f32.gmra.mxu2 %v642_v14  ;;  %776 = vmatmul.f32.gmra.mxu3 %v650_v15 }
 0x1bf   : > { %v684_v16 = vpop.f32.mrf.mxu0  ;;  %v708_v17 = vpop.f32.mrf.mxu1 }
 0x1c6   : > { %v732_v18 = vpop.f32.mrf.mxu2  ;;  %v756_v19 = vpop.f32.mrf.mxu3 }
 0x1c7   : > { %v687_v20 = vpop.f32.mrf.mxu0  ;;  %v711_v21 = vpop.f32.mrf.mxu1 }
 0x1c8   : > { %v2844_v22 = vpack.c.bf16 %v687_v20, %v684_v16  ;;  %v2864_v23 = vpack.c.bf16 %v711_v21, %v708_v17 }
 0x1ca   : > { %2845 = vst [vmem:[#allocation3] sm:$0xff] %v2844_v22  }
 0x1cb   : > { %2939 = vst [vmem:[#allocation3 + $0x8] sm:$0xff] %v2864_v23  }
 0x1ce   : > { %v735_v24 = vpop.f32.mrf.mxu2  ;;  %v759_v25 = vpop.f32.mrf.mxu3 }
 0x1cf   : > { %v2884_v26 = vpack.c.bf16 %v735_v24, %v732_v18  ;;  %v2904_v27 = vpack.c.bf16 %v759_v25, %v756_v19  ;;  %v690_v28 = vpop.f32.mrf.mxu0  ;;  %v714_v29 = vpop.f32.mrf.mxu1 }
 0x1d1   : > { %2943 = vst [vmem:[#allocation3 + $0x70] sm:$0xff] %v2884_v26  }
 0x1d2   : > { %2947 = vst [vmem:[#allocation3 + $0x10] sm:$0xff] %v2904_v27  }
 0x1d6   : > { %v738_v30 = vpop.f32.mrf.mxu2  ;;  %v762_v31 = vpop.f32.mrf.mxu3 }
 0x1d7   : > { %v693_v32 = vpop.f32.mrf.mxu0  ;;  %v717_v33 = vpop.f32.mrf.mxu1 }
 0x1d8   : > { %v2849_v34 = vpack.c.bf16 %v693_v32, %v690_v28  ;;  %v2869_v35 = vpack.c.bf16 %v717_v33, %v714_v29 }
 0x1da   : > { %2936 = vst [vmem:[#allocation3 + $0x48] sm:$0xff] %v2849_v34  }
 0x1db   : > { %2940 = vst [vmem:[#allocation3 + $0x50] sm:$0xff] %v2869_v35  }
 0x1de   : > { %v741_v36 = vpop.f32.mrf.mxu2  ;;  %v765_v37 = vpop.f32.mrf.mxu3 }
 0x1df   : > { %v2889_v38 = vpack.c.bf16 %v741_v36, %v738_v30  ;;  %v2909_v39 = vpack.c.bf16 %v765_v37, %v762_v31  ;;  %v696_v40 = vpop.f32.mrf.mxu0  ;;  %v720_v41 = vpop.f32.mrf.mxu1 }
 0x1e1   : > { %2944 = vst [vmem:[#allocation3 + $0x60] sm:$0xff] %v2889_v38  }
 0x1e2   : > { %2948 = vst [vmem:[#allocation3 + $0x30] sm:$0xff] %v2909_v39  }
 0x1e6   : > { %v744_v42 = vpop.f32.mrf.mxu2  ;;  %v768_v43 = vpop.f32.mrf.mxu3 }
 0x1e7   : > { %v699_v44 = vpop.f32.mrf.mxu0  ;;  %v723_v45 = vpop.f32.mrf.mxu1 }
 0x1e8   : > { %v2854_v46 = vpack.c.bf16 %v699_v44, %v696_v40  ;;  %v2874_v47 = vpack.c.bf16 %v723_v45, %v720_v41 }
 0x1ea   : > { %2937 = vst [vmem:[#allocation3 + $0x68] sm:$0xff] %v2854_v46  }
 0x1eb   : > { %2941 = vst [vmem:[#allocation3 + $0x40] sm:$0xff] %v2874_v47  }
 0x1ee   : > { %v747_v48 = vpop.f32.mrf.mxu2  ;;  %v771_v49 = vpop.f32.mrf.mxu3 }
 0x1ef   : > { %v2894_v50 = vpack.c.bf16 %v747_v48, %v744_v42  ;;  %v2914_v51 = vpack.c.bf16 %v771_v49, %v768_v43  ;;  %v702_v52 = vpop.f32.mrf.mxu0  ;;  %v726_v53 = vpop.f32.mrf.mxu1 }
 0x1f1   : > { %2945 = vst [vmem:[#allocation3 + $0x18] sm:$0xff] %v2894_v50  }
 0x1f2   : > { %2949 = vst [vmem:[#allocation3 + $0x28] sm:$0xff] %v2914_v51  }
 0x1f6   : > { %v750_v54 = vpop.f32.mrf.mxu2  ;;  %v774_v55 = vpop.f32.mrf.mxu3 }
 0x1f7   : > { %v705_v56 = vpop.f32.mrf.mxu0  ;;  %v729_v57 = vpop.f32.mrf.mxu1 }
 0x1f8   : > { %v2859_v58 = vpack.c.bf16 %v705_v56, %v702_v52  ;;  %v2879_v59 = vpack.c.bf16 %v729_v57, %v726_v53 }
 0x1fa   : > { %2938 = vst [vmem:[#allocation3 + $0x78] sm:$0xff] %v2859_v58  }
 0x1fb   : > { %2942 = vst [vmem:[#allocation3 + $0x38] sm:$0xff] %v2879_v59  }
 0x1fe   : > { %v753_v60 = vpop.f32.mrf.mxu2  ;;  %v777_v61 = vpop.f32.mrf.mxu3 }
 0x1ff   : > { %v2899_v62 = vpack.c.bf16 %v753_v60, %v750_v54  ;;  %v2919_v63 = vpack.c.bf16 %v777_v61, %v774_v55 }
 0x201   : > { %2946 = vst [vmem:[#allocation3 + $0x20] sm:$0xff] %v2899_v62  }
 0x202   : > { %2950 = vst [vmem:[#allocation3 + $0x58] sm:$0xff] %v2919_v63  }
 0x203 PF: > { %v2752_v0 = vld [vmem:[#allocation3 + $0x38] sm:$0xff]  ;;  %v2751_v2 = vld [vmem:[#allocation3 + $0x40] sm:$0xff]  ;;  %v2759_v3 = vld [vmem:[#allocation3 + $0x28] sm:$0xff]  ;;  %p2702_p4 = scmp.eq.s32.totalorder %s3430_s18, 1 }
 0x204   : > { %1240 = vmatpush.bf16.msra.mxu0 %v2752_v0  ;;  %3047 = vmatpush.bf16.msra.mxu2 %v2752_v0  ;;  %v2750_v4 = vld [vmem:[#allocation3 + $0x50] sm:$0xff]  ;;  %v2749_v6 = vld [vmem:[#allocation3 + $0x8] sm:$0xff]  ;;  %v2748_v8 = vld [vmem:[#allocation3 + $0x78] sm:$0xff] }
 0x205   : > { %v2758_v5 = vld [vmem:[#allocation3 + $0x30] sm:$0xff]  ;;  %v2747_v10 = vld [vmem:[#allocation3 + $0x68] sm:$0xff]  ;;  %v2755_v11 = vld [vmem:[#allocation3 + $0x18] sm:$0xff] }
 0x206   : > { %v2757_v7 = vld [vmem:[#allocation3 + $0x10] sm:$0xff]  ;;  %v2746_v12 = vld [vmem:[#allocation3 + $0x48] sm:$0xff]  ;;  %v2754_v13 = vld [vmem:[#allocation3 + $0x60] sm:$0xff] }
 0x207   : > { %v2745_v14 = vld [vmem:[#allocation3] sm:$0xff]  ;;  %v2753_v15 = vld [vmem:[#allocation3 + $0x70] sm:$0xff]  ;;  %v2714_v17 = vld [vmem:[#allocation11 + $0x4] sm:$0xf0] }
 0x208   : > { %1241 = vmatpush.bf16.msra.mxu0 %v2751_v2  ;;  %3048 = vmatpush.bf16.msra.mxu2 %v2751_v2  ;;  %v2756_v9 = vld [vmem:[#allocation3 + $0x20] sm:$0xff]  ;;  %v2730_v19 = vld [vmem:[#allocation11 + $0x84] sm:$0xf0]  ;;  %v2514_v21 = vld [vmem:[#allocation11 + $0x8] sm:$0xf0] }
 0x209   : > { %v2760_v1 = vld [vmem:[#allocation3 + $0x58] sm:$0xff]  ;;  %v2512_v16 = vld [vmem:[#allocation11] sm:$0xf]  ;;  %v2713_v20 = vld [vmem:[#allocation11 + $0x4] sm:$0xf] }
 0x20a   : > { %1329 = vmatpush.bf16.msra.mxu1 %v2760_v1  ;;  %3055 = vmatpush.bf16.msra.mxu3 %v2760_v1  ;;  %v2576_v18 = vld [vmem:[#allocation11 + $0x80] sm:$0xf]  ;;  %v2729_v22 = vld [vmem:[#allocation11 + $0x84] sm:$0xf]  ;;  %v2578_v23 = vld [vmem:[#allocation11 + $0x88] sm:$0xf0]  ;;  %v2513_v24 = vor.u32 %v2714_v17, %v2512_v16  ;;  %v2517_v26 = vor.u32 %v2713_v20, %v2514_v21 }
 0x20b   : > { %v2577_v25 = vor.u32 %v2730_v19, %v2576_v18  ;;  %v2581_v27 = vor.u32 %v2729_v22, %v2578_v23  ;;  %v2520_v28 = vld [vmem:[#allocation11 + $0x10] sm:$0xf]  ;;  %v2716_v29 = vld [vmem:[#allocation11 + $0x14] sm:$0xf0]  ;;  %v2715_v32 = vld [vmem:[#allocation11 + $0x14] sm:$0xf] }
 0x20c   : > { %1242 = vmatpush.bf16.msra.mxu0 %v2750_v4  ;;  %3049 = vmatpush.bf16.msra.mxu2 %v2750_v4  ;;  %v2584_v30 = vld [vmem:[#allocation11 + $0x90] sm:$0xf]  ;;  %v2732_v31 = vld [vmem:[#allocation11 + $0x94] sm:$0xf0]  ;;  %v2522_v33 = vld [vmem:[#allocation11 + $0x18] sm:$0xf0]  ;;  %v2521_v36 = vor.u32 %v2716_v29, %v2520_v28 }
 0x20d   : > { %v2731_v34 = vld [vmem:[#allocation11 + $0x94] sm:$0xf]  ;;  %v2586_v35 = vld [vmem:[#allocation11 + $0x98] sm:$0xf0]  ;;  %v2585_v37 = vor.u32 %v2732_v31, %v2584_v30  ;;  %v2525_v38 = vor.u32 %v2715_v32, %v2522_v33  ;;  %v2528_v40 = vld [vmem:[#allocation11 + $0x20] sm:$0xf] }
 0x20e   : > { %1330 = vmatpush.bf16.msra.mxu1 %v2759_v3  ;;  %3056 = vmatpush.bf16.msra.mxu3 %v2759_v3  ;;  %v2589_v39 = vor.u32 %v2731_v34, %v2586_v35  ;;  %v2718_v41 = vld [vmem:[#allocation11 + $0x24] sm:$0xf0]  ;;  %v2592_v42 = vld [vmem:[#allocation11 + $0xa0] sm:$0xf]  ;;  %v2717_v44 = vld [vmem:[#allocation11 + $0x24] sm:$0xf] }
 0x20f   : > { %v2734_v43 = vld [vmem:[#allocation11 + $0xa4] sm:$0xf0]  ;;  %v2530_v45 = vld [vmem:[#allocation11 + $0x28] sm:$0xf0]  ;;  %v2733_v46 = vld [vmem:[#allocation11 + $0xa4] sm:$0xf]  ;;  %v2529_v48 = vor.u32 %v2718_v41, %v2528_v40 }
 0x210   : > { %1243 = vmatpush.bf16.msra.mxu0 %v2749_v6  ;;  %3050 = vmatpush.bf16.msra.mxu2 %v2749_v6  ;;  %v2594_v47 = vld [vmem:[#allocation11 + $0xa8] sm:$0xf0]  ;;  %v2593_v49 = vor.u32 %v2734_v43, %v2592_v42  ;;  %v2533_v50 = vor.u32 %v2717_v44, %v2530_v45  ;;  %v2536_v52 = vld [vmem:[#allocation11 + $0x30] sm:$0xf]  ;;  %v2720_v53 = vld [vmem:[#allocation11 + $0x34] sm:$0xf0] }
 0x211   : > { %v2597_v51 = vor.u32 %v2733_v46, %v2594_v47  ;;  %v2600_v54 = vld [vmem:[#allocation11 + $0xb0] sm:$0xf]  ;;  %v2736_v55 = vld [vmem:[#allocation11 + $0xb4] sm:$0xf0]  ;;  %v2719_v56 = vld [vmem:[#allocation11 + $0x34] sm:$0xf]  ;;  %v2537_v60 = vor.u32 %v2720_v53, %v2536_v52 }
 0x212   : > { %1331 = vmatpush.bf16.msra.mxu1 %v2758_v5  ;;  %3057 = vmatpush.bf16.msra.mxu3 %v2758_v5  ;;  %v2538_v57 = vld [vmem:[#allocation11 + $0x38] sm:$0xf0]  ;;  %v2735_v58 = vld [vmem:[#allocation11 + $0xb4] sm:$0xf]  ;;  %v2601_v61 = vor.u32 %v2736_v55, %v2600_v54  ;;  %v2544_v0 = vld [vmem:[#allocation11 + $0x40] sm:$0xf] }
 0x213   : > { %v2602_v59 = vld [vmem:[#allocation11 + $0xb8] sm:$0xf0]  ;;  %v2541_v62 = vor.u32 %v2719_v56, %v2538_v57  ;;  %v2722_v1 = vld [vmem:[#allocation11 + $0x44] sm:$0xf0]  ;;  %v2608_v2 = vld [vmem:[#allocation11 + $0xc0] sm:$0xf] }
 0x214   : > { %1244 = vmatpush.bf16.msra.mxu0 %v2748_v8  ;;  %3051 = vmatpush.bf16.msra.mxu2 %v2748_v8  ;;  %v2605_v63 = vor.u32 %v2735_v58, %v2602_v59  ;;  %v2738_v3 = vld [vmem:[#allocation11 + $0xc4] sm:$0xf0]  ;;  %v2721_v4 = vld [vmem:[#allocation11 + $0x44] sm:$0xf]  ;;  %v2546_v5 = vld [vmem:[#allocation11 + $0x48] sm:$0xf0]  ;;  %v2545_v8 = vor.u32 %v2722_v1, %v2544_v0 }
 0x215   : > { %v2737_v6 = vld [vmem:[#allocation11 + $0xc4] sm:$0xf]  ;;  %v2723_v16 = vld [vmem:[#allocation11 + $0x54] sm:$0xf]  ;;  %v2554_v17 = vld [vmem:[#allocation11 + $0x58] sm:$0xf0] }
 0x216   : > { %1332 = vmatpush.bf16.msra.mxu1 %v2757_v7  ;;  %3058 = vmatpush.bf16.msra.mxu3 %v2757_v7  ;;  %v2610_v7 = vld [vmem:[#allocation11 + $0xc8] sm:$0xf0]  ;;  %v2739_v18 = vld [vmem:[#allocation11 + $0xd4] sm:$0xf]  ;;  %v2618_v19 = vld [vmem:[#allocation11 + $0xd8] sm:$0xf0]  ;;  %v2557_v22 = vor.u32 %v2723_v16, %v2554_v17 }
 0x217   : > { %v2621_v23 = vor.u32 %v2739_v18, %v2618_v19  ;;  %v2725_v28 = vld [vmem:[#allocation11 + $0x64] sm:$0xf]  ;;  %v2562_v29 = vld [vmem:[#allocation11 + $0x68] sm:$0xf0]  ;;  %v2727_v40 = vld [vmem:[#allocation11 + $0x74] sm:$0xf] }
 0x218   : > { %1245 = vmatpush.bf16.msra.mxu0 %v2747_v10  ;;  %3052 = vmatpush.bf16.msra.mxu2 %v2747_v10  ;;  %v2549_v10 = vor.u32 %v2721_v4, %v2546_v5  ;;  %v2741_v30 = vld [vmem:[#allocation11 + $0xe4] sm:$0xf]  ;;  %v2626_v31 = vld [vmem:[#allocation11 + $0xe8] sm:$0xf0]  ;;  %v2565_v34 = vor.u32 %v2725_v28, %v2562_v29  ;;  %v2570_v41 = vld [vmem:[#allocation11 + $0x78] sm:$0xf0] }
 0x219   : > { %v2629_v35 = vor.u32 %v2741_v30, %v2626_v31  ;;  %v2743_v42 = vld [vmem:[#allocation11 + $0xf4] sm:$0xf]  ;;  %v2634_v43 = vld [vmem:[#allocation11 + $0xf8] sm:$0xf0]  ;;  %v2573_v46 = vor.u32 %v2727_v40, %v2570_v41 }
 0x21a   : > { %1333 = vmatpush.bf16.msra.mxu1 %v2756_v9  ;;  %3059 = vmatpush.bf16.msra.mxu3 %v2756_v9  ;;  %v2609_v9 = vor.u32 %v2738_v3, %v2608_v2  ;;  %v2637_v47 = vor.u32 %v2743_v42, %v2634_v43 }
 0x21c   : > { %1246 = vmatpush.bf16.msra.mxu0 %v2746_v12  ;;  %3053 = vmatpush.bf16.msra.mxu2 %v2746_v12  ;;  %v2552_v12 = vld [vmem:[#allocation11 + $0x50] sm:$0xf] }
 0x21e   : > { %1334 = vmatpush.bf16.msra.mxu1 %v2755_v11  ;;  %3060 = vmatpush.bf16.msra.mxu3 %v2755_v11  ;;  %v2613_v11 = vor.u32 %v2737_v6, %v2610_v7 }
 0x220   : > { %1247 = vmatpush.bf16.msra.mxu0 %v2745_v14  ;;  %3054 = vmatpush.bf16.msra.mxu2 %v2745_v14  ;;  %v2616_v14 = vld [vmem:[#allocation11 + $0xd0] sm:$0xf] }
 0x222   : > { %1335 = vmatpush.bf16.msra.mxu1 %v2754_v13  ;;  %3061 = vmatpush.bf16.msra.mxu3 %v2754_v13  ;;  %v2724_v13 = vld [vmem:[#allocation11 + $0x54] sm:$0xf0] }
 0x223   : > { %1248 = vmatmul.bf16.vlgmr.msra.gmra.mxu0 %v2513_v24  ;;  %1288 = vmatmul.bf16.vlgmr.msra.gmra.mxu2 %v2577_v25  ;;  %v2553_v20 = vor.u32 %v2724_v13, %v2552_v12  ;;  %v2560_v24 = vld [vmem:[#allocation11 + $0x60] sm:$0xf]  ;;  %v2726_v25 = vld [vmem:[#allocation11 + $0x64] sm:$0xf0] }
 0x224   : > { %v2561_v32 = vor.u32 %v2726_v25, %v2560_v24 }
 0x226   : > { %1336 = vmatpush.bf16.msra.mxu1 %v2753_v15  ;;  %3062 = vmatpush.bf16.msra.mxu3 %v2753_v15  ;;  %v2740_v15 = vld [vmem:[#allocation11 + $0xd4] sm:$0xf0] }
 0x227   : > { %v2617_v21 = vor.u32 %v2740_v15, %v2616_v14 }
 0x229   : > { %1337 = vmatmul.bf16.vlgmr.msra.gmra.mxu1 %v2517_v26  ;;  %1377 = vmatmul.bf16.vlgmr.msra.gmra.mxu3 %v2581_v27  ;;  %v2624_v26 = vld [vmem:[#allocation11 + $0xe0] sm:$0xf]  ;;  %v2742_v27 = vld [vmem:[#allocation11 + $0xe4] sm:$0xf0] }
 0x22a   : > { %v2625_v33 = vor.u32 %v2742_v27, %v2624_v26 }
 0x233   : > { %1253 = vmatmul.bf16.gmra.mxu0 %v2521_v36  ;;  %1293 = vmatmul.bf16.gmra.mxu2 %v2585_v37  ;;  %v2568_v36 = vld [vmem:[#allocation11 + $0x70] sm:$0xf]  ;;  %v2728_v37 = vld [vmem:[#allocation11 + $0x74] sm:$0xf0] }
 0x234   : > { %v2569_v44 = vor.u32 %v2728_v37, %v2568_v36 }
 0x239   : > { %1342 = vmatmul.bf16.gmra.mxu1 %v2525_v38  ;;  %1382 = vmatmul.bf16.gmra.mxu3 %v2589_v39  ;;  %v2632_v38 = vld [vmem:[#allocation11 + $0xf0] sm:$0xf]  ;;  %v2744_v39 = vld [vmem:[#allocation11 + $0xf4] sm:$0xf0] }
 0x23a   : > { %v2633_v45 = vor.u32 %v2744_v39, %v2632_v38 }
 0x243   : > { %1258 = vmatmul.bf16.gmra.mxu0 %v2529_v48  ;;  %1298 = vmatmul.bf16.gmra.mxu2 %v2593_v49 }
 0x249   : > { %1347 = vmatmul.bf16.gmra.mxu1 %v2533_v50  ;;  %1387 = vmatmul.bf16.gmra.mxu3 %v2597_v51 }
 0x253   : > { %1263 = vmatmul.bf16.gmra.mxu0 %v2537_v60  ;;  %1303 = vmatmul.bf16.gmra.mxu2 %v2601_v61 }
 0x259   : > { %1352 = vmatmul.bf16.gmra.mxu1 %v2541_v62  ;;  %1392 = vmatmul.bf16.gmra.mxu3 %v2605_v63 }
 0x263   : > { %1268 = vmatmul.bf16.gmra.mxu0 %v2545_v8  ;;  %1308 = vmatmul.bf16.gmra.mxu2 %v2609_v9 }
 0x269   : > { %1357 = vmatmul.bf16.gmra.mxu1 %v2549_v10  ;;  %1397 = vmatmul.bf16.gmra.mxu3 %v2613_v11 }
 0x273   : > { %1273 = vmatmul.bf16.gmra.mxu0 %v2553_v20  ;;  %1313 = vmatmul.bf16.gmra.mxu2 %v2617_v21 }
 0x279   : > { %1362 = vmatmul.bf16.gmra.mxu1 %v2557_v22  ;;  %1402 = vmatmul.bf16.gmra.mxu3 %v2621_v23 }
 0x283   : > { %1278 = vmatmul.bf16.gmra.mxu0 %v2561_v32  ;;  %1318 = vmatmul.bf16.gmra.mxu2 %v2625_v33 }
 0x289   : > { %1367 = vmatmul.bf16.gmra.mxu1 %v2565_v34  ;;  %1407 = vmatmul.bf16.gmra.mxu3 %v2629_v35 }
 0x293   : > { %1283 = vmatmul.bf16.gmra.mxu0 %v2569_v44  ;;  %1323 = vmatmul.bf16.gmra.mxu2 %v2633_v45 }
 0x299   : > { %1372 = vmatmul.bf16.gmra.mxu1 %v2573_v46  ;;  %1412 = vmatmul.bf16.gmra.mxu3 %v2637_v47 }
 0x2a0   : > { %v1249_v48 = vpop.f32.mrf.mxu0 }
 0x2a6   : > { %v1338_v49 = vpop.f32.mrf.mxu1  ;;  %v1289_v51 = vpop.f32.mrf.mxu2 }
 0x2a7   : > { %v3630_v50 = vadd.f32 %v1338_v49, %v1249_v48 }
 0x2a8   : > { %v1251_v54 = vpop.f32.mrf.mxu0 }
 0x2ac   : > { %v1378_v52 = vpop.f32.mrf.mxu3 }
 0x2ad   : > { %v3632_v53 = vadd.f32 %v1378_v52, %v1289_v51 }
 0x2ae   : > { %v1340_v55 = vpop.f32.mrf.mxu1  ;;  %v1291_v57 = vpop.f32.mrf.mxu2 }
 0x2af   : > { %v3634_v56 = vadd.f32 %v1340_v55, %v1251_v54 }
 0x2b0   : > { %v1254_v60 = vpop.f32.mrf.mxu0 }
 0x2b4   : > { %v1380_v58 = vpop.f32.mrf.mxu3 }
 0x2b5   : > { %v3636_v59 = vadd.f32 %v1380_v58, %v1291_v57 }
 0x2b6   : > { %v1343_v61 = vpop.f32.mrf.mxu1  ;;  %v1294_v63 = vpop.f32.mrf.mxu2 }
 0x2b7   : > { %v3638_v62 = vadd.f32 %v1343_v61, %v1254_v60 }
 0x2b8   : > { %v1256_v2 = vpop.f32.mrf.mxu0 }
 0x2bc   : > { %v1383_v0 = vpop.f32.mrf.mxu3 }
 0x2bd   : > { %v3640_v1 = vadd.f32 %v1383_v0, %v1294_v63 }
 0x2be   : > { %v1345_v3 = vpop.f32.mrf.mxu1  ;;  %v1296_v5 = vpop.f32.mrf.mxu2 }
 0x2bf   : > { %v3642_v4 = vadd.f32 %v1345_v3, %v1256_v2 }
 0x2c0   : > { %v1259_v8 = vpop.f32.mrf.mxu0 }
 0x2c4   : > { %v1385_v6 = vpop.f32.mrf.mxu3 }
 0x2c5   : > { %v3644_v7 = vadd.f32 %v1385_v6, %v1296_v5 }
 0x2c6   : > { %v1348_v9 = vpop.f32.mrf.mxu1  ;;  %v1299_v11 = vpop.f32.mrf.mxu2 }
 0x2c7   : > { %v3646_v10 = vadd.f32 %v1348_v9, %v1259_v8 }
 0x2c8   : > { %v1261_v14 = vpop.f32.mrf.mxu0 }
 0x2cc   : > { %v1388_v12 = vpop.f32.mrf.mxu3 }
 0x2cd   : > { %v3648_v13 = vadd.f32 %v1388_v12, %v1299_v11 }
 0x2ce   : > { %v1350_v15 = vpop.f32.mrf.mxu1  ;;  %v1301_v17 = vpop.f32.mrf.mxu2 }
 0x2cf   : > { %v3650_v16 = vadd.f32 %v1350_v15, %v1261_v14 }
 0x2d0   : > { %v1264_v20 = vpop.f32.mrf.mxu0 }
 0x2d4   : > { %v1390_v18 = vpop.f32.mrf.mxu3 }
 0x2d5   : > { %v3652_v19 = vadd.f32 %v1390_v18, %v1301_v17 }
 0x2d6   : > { %v1353_v21 = vpop.f32.mrf.mxu1  ;;  %v1304_v23 = vpop.f32.mrf.mxu2 }
 0x2d7   : > { %v3654_v22 = vadd.f32 %v1353_v21, %v1264_v20 }
 0x2d8   : > { %v1266_v26 = vpop.f32.mrf.mxu0 }
 0x2dc   : > { %v1393_v24 = vpop.f32.mrf.mxu3 }
 0x2dd   : > { %v3656_v25 = vadd.f32 %v1393_v24, %v1304_v23 }
 0x2de   : > { %v1355_v27 = vpop.f32.mrf.mxu1  ;;  %v1306_v29 = vpop.f32.mrf.mxu2 }
 0x2df   : > { %v3658_v28 = vadd.f32 %v1355_v27, %v1266_v26 }
 0x2e0   : > { %v1269_v32 = vpop.f32.mrf.mxu0 }
 0x2e4   : > { %v1395_v30 = vpop.f32.mrf.mxu3 }
 0x2e5   : > { %v3660_v31 = vadd.f32 %v1395_v30, %v1306_v29 }
 0x2e6   : > { %v1358_v33 = vpop.f32.mrf.mxu1  ;;  %v1309_v35 = vpop.f32.mrf.mxu2 }
 0x2e7   : > { %v3662_v34 = vadd.f32 %v1358_v33, %v1269_v32 }
 0x2e8   : > { %v1271_v38 = vpop.f32.mrf.mxu0 }
 0x2ec   : > { %v1398_v36 = vpop.f32.mrf.mxu3 }
 0x2ed   : > { %v3664_v37 = vadd.f32 %v1398_v36, %v1309_v35 }
 0x2ee   : > { %v1360_v39 = vpop.f32.mrf.mxu1  ;;  %v1311_v41 = vpop.f32.mrf.mxu2 }
 0x2ef   : > { %v3666_v40 = vadd.f32 %v1360_v39, %v1271_v38 }
 0x2f0   : > { %v1274_v44 = vpop.f32.mrf.mxu0 }
 0x2f4   : > { %v1400_v42 = vpop.f32.mrf.mxu3 }
 0x2f5   : > { %v3668_v43 = vadd.f32 %v1400_v42, %v1311_v41 }
 0x2f6   : > { %v1363_v45 = vpop.f32.mrf.mxu1  ;;  %v1314_v47 = vpop.f32.mrf.mxu2 }
 0x2f7   : > { %v3670_v46 = vadd.f32 %v1363_v45, %v1274_v44 }
 0x2f8   : > { %v1276_v51 = vpop.f32.mrf.mxu0 }
 0x2fc   : > { %v1403_v48 = vpop.f32.mrf.mxu3 }
 0x2fd   : > { %v3672_v49 = vadd.f32 %v1403_v48, %v1314_v47 }
 0x2fe   : > { %v1365_v52 = vpop.f32.mrf.mxu1  ;;  %v1316_v55 = vpop.f32.mrf.mxu2 }
 0x2ff   : > { %v3674_v54 = vadd.f32 %v1365_v52, %v1276_v51 }
 0x300   : > { %v1279_v60 = vpop.f32.mrf.mxu0 }
 0x304   : > { %v1405_v57 = vpop.f32.mrf.mxu3 }
 0x305   : > { %v3676_v58 = vadd.f32 %v1405_v57, %v1316_v55 }
 0x306   : > { %v1368_v61 = vpop.f32.mrf.mxu1  ;;  %v1319_v0 = vpop.f32.mrf.mxu2 }
 0x307   : > { %v3678_v63 = vadd.f32 %v1368_v61, %v1279_v60 }
 0x308   : > { %v1281_v5 = vpop.f32.mrf.mxu0 }
 0x30c   : > { %v1408_v2 = vpop.f32.mrf.mxu3 }
 0x30d   : > { %v3680_v3 = vadd.f32 %v1408_v2, %v1319_v0 }
 0x30e   : > { %v1370_v6 = vpop.f32.mrf.mxu1  ;;  %v1321_v9 = vpop.f32.mrf.mxu2 }
 0x30f   : > { %v3682_v8 = vadd.f32 %v1370_v6, %v1281_v5 }
 0x310   : > { %v1284_v14 = vpop.f32.mrf.mxu0 }
 0x314   : > { %v1410_v11 = vpop.f32.mrf.mxu3 }
 0x315   : > { %v3684_v12 = vadd.f32 %v1410_v11, %v1321_v9 }
 0x316   : > { %v1373_v15 = vpop.f32.mrf.mxu1  ;;  %v1324_v18 = vpop.f32.mrf.mxu2 }
 0x317   : > { %v3686_v17 = vadd.f32 %v1373_v15, %v1284_v14 }
 0x318   : > { %v1286_v23 = vpop.f32.mrf.mxu0 }
 0x31c   : > { %v1413_v20 = vpop.f32.mrf.mxu3 }
 0x31d   : > { %v3688_v21 = vadd.f32 %v1413_v20, %v1324_v18 }
 0x31e   : > { %v1375_v24 = vpop.f32.mrf.mxu1  ;;  %v1326_v27 = vpop.f32.mrf.mxu2 }
 0x31f   : > { %v3690_v26 = vadd.f32 %v1375_v24, %v1286_v23 }
 0x321   : > { %1521 = sbr.rel (%p2702_p4) target bundleno = 838 (0x346), region = 76 }
 0x324   : > { %v1415_v29 = vpop.f32.mrf.mxu3 }
 0x325   : > { %v3692_v30 = vadd.f32 %v1415_v29, %v1326_v27 }
 0x326   : > { %1523 = vst [vmem:[#allocation2 + $0xb0] sm:$0xff] %v3630_v50 }
 0x327   : > { %1524 = vst [vmem:[#allocation2] sm:$0xff] %v3634_v56 }
 0x328   : > { %1525 = vst [vmem:[#allocation2 + $0xd8] sm:$0xff] %v3638_v62 }
 0x329   : > { %1526 = vst [vmem:[#allocation2 + $0x18] sm:$0xff] %v3642_v4 }
 0x32a   : > { %1527 = vst [vmem:[#allocation2 + $0x50] sm:$0xff] %v3646_v10 }
 0x32b   : > { %1528 = vst [vmem:[#allocation2 + $0x68] sm:$0xff] %v3650_v16 }
 0x32c   : > { %1529 = vst [vmem:[#allocation2 + $0x30] sm:$0xff] %v3654_v22 }
 0x32d   : > { %1530 = vst [vmem:[#allocation2 + $0x48] sm:$0xff] %v3658_v28 }
 0x32e   : > { %1531 = vst [vmem:[#allocation2 + $0x80] sm:$0xff] %v3662_v34 }
 0x32f   : > { %1532 = vst [vmem:[#allocation2 + $0x88] sm:$0xff] %v3666_v40 }
 0x330   : > { %1533 = vst [vmem:[#allocation2 + $0xe8] sm:$0xff] %v3670_v46 }
 0x331   : > { %1534 = vst [vmem:[#allocation2 + $0xb8] sm:$0xff] %v3674_v54 }
 0x332   : > { %1535 = vst [vmem:[#allocation2 + $0x60] sm:$0xff] %v3678_v63 }
 0x333   : > { %1536 = vst [vmem:[#allocation2 + $0xf0] sm:$0xff] %v3682_v8 }
 0x334   : > { %1537 = vst [vmem:[#allocation2 + $0x8] sm:$0xff] %v3686_v17 }
 0x335   : > { %1538 = vst [vmem:[#allocation2 + $0x78] sm:$0xff] %v3690_v26 }
 0x336   : > { %1539 = vst [vmem:[#allocation2 + $0x38] sm:$0xff] %v3632_v53 }
 0x337   : > { %1540 = vst [vmem:[#allocation2 + $0x58] sm:$0xff] %v3636_v59 }
 0x338   : > { %1541 = vst [vmem:[#allocation2 + $0x40] sm:$0xff] %v3640_v1 }
 0x339   : > { %1542 = vst [vmem:[#allocation2 + $0xc8] sm:$0xff] %v3644_v7 }
 0x33a   : > { %1543 = vst [vmem:[#allocation2 + $0xe0] sm:$0xff] %v3648_v13 }
 0x33b   : > { %1544 = vst [vmem:[#allocation2 + $0x90] sm:$0xff] %v3652_v19 }
 0x33c   : > { %1545 = vst [vmem:[#allocation2 + $0x70] sm:$0xff] %v3656_v25 }
 0x33d   : > { %1546 = vst [vmem:[#allocation2 + $0xc0] sm:$0xff] %v3660_v31 }
 0x33e   : > { %1547 = vst [vmem:[#allocation2 + $0xa8] sm:$0xff] %v3664_v37 }
 0x33f   : > { %1548 = vst [vmem:[#allocation2 + $0xd0] sm:$0xff] %v3668_v43 }
 0x340   : > { %1549 = vst [vmem:[#allocation2 + $0x10] sm:$0xff] %v3672_v49 }
 0x341   : > { %1550 = vst [vmem:[#allocation2 + $0x28] sm:$0xff] %v3676_v58 }
 0x342   : > { %1551 = vst [vmem:[#allocation2 + $0xa0] sm:$0xff] %v3680_v3 }
 0x343   : > { %1552 = vst [vmem:[#allocation2 + $0xf8] sm:$0xff] %v3684_v12 }
 0x344   : > { %1553 = vst [vmem:[#allocation2 + $0x20] sm:$0xff] %v3688_v21 }
 0x345   : > { %1554 = vst [vmem:[#allocation2 + $0x98] sm:$0xff] %v3692_v30 }
 0x346 PF: > { %v1559_v32 = vmul.f32 %v3646_v10, %v3646_v10  ;;  %v1557_v33 = vmul.f32 %v3638_v62, %v3638_v62  ;;  %v1555_v35 = vmul.f32 %v3630_v50, %v3630_v50  ;;  %v1560_v36 = vmul.f32 %v3650_v16, %v3650_v16 }
 0x347   : > { %v1558_v38 = vmul.f32 %v3642_v4, %v3642_v4  ;;  %v1556_v39 = vmul.f32 %v3634_v56, %v3634_v56  ;;  %v1563_v41 = vmul.f32 %v3662_v34, %v3662_v34  ;;  %v1562_v42 = vmul.f32 %v3658_v28, %v3658_v28 }
 0x348   : > { %1595 = vadd.xlane.f32.xlu2 %v1559_v32  ;;  %1591 = vadd.xlane.f32.xlu1 %v1557_v33  ;;  %v1561_v44 = vmul.f32 %v3654_v22, %v3654_v22  ;;  %v1566_v45 = vmul.f32 %v3674_v54, %v3674_v54  ;;  %v1565_v47 = vmul.f32 %v3670_v46, %v3670_v46 }
 0x349   : > { %1587 = vadd.xlane.f32.xlu0 %v1555_v35  ;;  %v1564_v48 = vmul.f32 %v3666_v40, %v3666_v40  ;;  %v1569_v51 = vmul.f32 %v3686_v17, %v3686_v17  ;;  %v1568_v52 = vmul.f32 %v3682_v8, %v3682_v8  ;;  %v1567_v55 = vmul.f32 %v3678_v63, %v3678_v63 }
 0x34a   : > { %v1572_v57 = vmul.f32 %v3636_v59, %v3636_v59  ;;  %v1571_v60 = vmul.f32 %v3632_v53, %v3632_v53  ;;  %v1570_v61 = vmul.f32 %v3690_v26, %v3690_v26  ;;  %v1575_v0 = vmul.f32 %v3648_v13, %v3648_v13 }
 0x34b   : > { %v1574_v2 = vmul.f32 %v3644_v7, %v3644_v7  ;;  %v1573_v5 = vmul.f32 %v3640_v1, %v3640_v1  ;;  %v1578_v6 = vmul.f32 %v3660_v31, %v3660_v31  ;;  %v1577_v9 = vmul.f32 %v3656_v25, %v3656_v25 }
 0x34c   : > { %v1576_v11 = vmul.f32 %v3652_v19, %v3652_v19  ;;  %v1581_v14 = vmul.f32 %v3672_v49, %v3672_v49  ;;  %v1580_v15 = vmul.f32 %v3668_v43, %v3668_v43  ;;  %v1579_v18 = vmul.f32 %v3664_v37, %v3664_v37 }
 0x34d   : > { %v1584_v20 = vmul.f32 %v3684_v12, %v3684_v12  ;;  %v1583_v23 = vmul.f32 %v3680_v3, %v3680_v3  ;;  %v1582_v24 = vmul.f32 %v3676_v58, %v3676_v58  ;;  %v1586_v27 = vmul.f32 %v3692_v30, %v3692_v30 }
 0x34e   : > { %v1585_v29 = vmul.f32 %v3688_v21, %v3688_v21 }
 0x350   : > { %1597 = vadd.xlane.f32.xlu2 %v1560_v36  ;;  %1593 = vadd.xlane.f32.xlu1 %v1558_v38 }
 0x351   : > { %1589 = vadd.xlane.f32.xlu0 %v1556_v39 }
 0x358   : > { %1603 = vadd.xlane.f32.xlu2 %v1563_v41  ;;  %1601 = vadd.xlane.f32.xlu1 %v1562_v42 }
 0x359   : > { %1599 = vadd.xlane.f32.xlu0 %v1561_v44 }
 0x360   : > { %1609 = vadd.xlane.f32.xlu2 %v1566_v45  ;;  %1607 = vadd.xlane.f32.xlu1 %v1565_v47 }
 0x361   : > { %1605 = vadd.xlane.f32.xlu0 %v1564_v48 }
 0x368   : > { %1615 = vadd.xlane.f32.xlu2 %v1569_v51  ;;  %1613 = vadd.xlane.f32.xlu1 %v1568_v52 }
 0x369   : > { %1611 = vadd.xlane.f32.xlu0 %v1567_v55 }
 0x370   : > { %1621 = vadd.xlane.f32.xlu2 %v1572_v57  ;;  %1619 = vadd.xlane.f32.xlu1 %v1571_v60 }
 0x371   : > { %1617 = vadd.xlane.f32.xlu0 %v1570_v61 }
 0x378   : > { %1627 = vadd.xlane.f32.xlu2 %v1575_v0  ;;  %1625 = vadd.xlane.f32.xlu1 %v1574_v2 }
 0x379   : > { %1623 = vadd.xlane.f32.xlu0 %v1573_v5 }
 0x380   : > { %1633 = vadd.xlane.f32.xlu2 %v1578_v6  ;;  %1631 = vadd.xlane.f32.xlu1 %v1577_v9 }
 0x381   : > { %1629 = vadd.xlane.f32.xlu0 %v1576_v11 }
 0x388   : > { %1639 = vadd.xlane.f32.xlu2 %v1581_v14  ;;  %1637 = vadd.xlane.f32.xlu1 %v1580_v15 }
 0x389   : > { %1635 = vadd.xlane.f32.xlu0 %v1579_v18 }
 0x390   : > { %1645 = vadd.xlane.f32.xlu2 %v1584_v20  ;;  %1643 = vadd.xlane.f32.xlu1 %v1583_v23 }
 0x391   : > { %1641 = vadd.xlane.f32.xlu0 %v1582_v24 }
 0x398   : > { %1649 = vadd.xlane.f32.xlu1 %v1586_v27 }
 0x399   : > { %1647 = vadd.xlane.f32.xlu0 %v1585_v29 }
 0x3bb   : > { %v1596_v32 = vpop.xlane.xlu2 %1595  ;;  %v1592_v33 = vpop.xlane.xlu1 %1591 }
 0x3bc   : > { %v1655_v35 = vmax.f32 %v1596_v32, 1e-24  ;;  %v1653_v36 = vmax.f32 %v1592_v33, 1e-24  ;;  %v1588_v38 = vpop.xlane.xlu0 %1587 }
 0x3bd   : > { %v1651_v39 = vmax.f32 %v1588_v38, 1e-24 }
 0x3be   : > { %3160 = vrsqrt.f32 %v1655_v35  ;;  %vm1729_vm0 = vweird.f32 %v1655_v35  ;;  %vm1709_vm2 = vweird.f32 %v1653_v36 }
 0x3bf   : > { %3162 = vrsqrt.f32 %v1653_v36  ;;  %vm1689_vm4 = vweird.f32 %v1651_v39 }
 0x3c0   : > { %3164 = vrsqrt.f32 %v1651_v39 }
 0x3c3   : > { %v1598_v41 = vpop.xlane.xlu2 %1597  ;;  %v1594_v42 = vpop.xlane.xlu1 %1593 }
 0x3c4   : > { %v3161_v44 = vpop.eup %3160  ;;  %v3793_v45 = vmax.f32 %v1598_v41, 1e-24  ;;  %v3795_v47 = vmax.f32 %v1594_v42, 1e-24  ;;  %v1590_v48 = vpop.xlane.xlu0 %1589 }
 0x3c5   : > { %v3163_v51 = vpop.eup %3162  ;;  %v1724_v52 = vmul.f32 %v3161_v44, %v1655_v35  ;;  %v3797_v55 = vmax.f32 %v1590_v48, 1e-24  ;;  %vm1730_vm1 = vweird.f32 %v3161_v44 }
 0x3c6   : > { %v3165_v57 = vpop.eup %3164  ;;  %v1704_v60 = vmul.f32 %v3163_v51, %v1653_v36  ;;  %3166 = vrsqrt.f32 %v3793_v45  ;;  %vm1710_vm3 = vweird.f32 %v3163_v51  ;;  %vm1731_vm6 = vmor %vm1729_vm0, %vm1730_vm1  ;;  %vm1739_vm9 = vweird.f32 %v3793_v45 }
 0x3c7   : > { %v1725_v61 = vmul.f32 %v3161_v44, %v1724_v52  ;;  %v1684_v0 = vmul.f32 %v3165_v57, %v1651_v39  ;;  %3168 = vrsqrt.f32 %v3795_v47  ;;  %vm1690_vm5 = vweird.f32 %v3165_v57  ;;  %vm1711_vm7 = vmor %vm1709_vm2, %vm1710_vm3 }
 0x3c8   : > { %v1705_v2 = vmul.f32 %v3163_v51, %v1704_v60  ;;  %3170 = vrsqrt.f32 %v3797_v55  ;;  %vm1691_vm8 = vmor %vm1689_vm4, %vm1690_vm5  ;;  %vm1719_vm14 = vweird.f32 %v3795_v47  ;;  %vm1699_vm15 = vweird.f32 %v3797_v55 }
 0x3c9   : > { %v1726_v5 = vmul.f32 0.5, %v1725_v61  ;;  %v1685_v6 = vmul.f32 %v3165_v57, %v1684_v0 }
 0x3ca   : > { %v1706_v9 = vmul.f32 0.5, %v1705_v2 }
 0x3cb   : > { %v1727_v11 = vsub.f32 1.5, %v1726_v5  ;;  %v1686_v14 = vmul.f32 0.5, %v1685_v6  ;;  %v1604_v15 = vpop.xlane.xlu2 %1603  ;;  %v1602_v18 = vpop.xlane.xlu1 %1601 }
 0x3cc   : > { %v3167_v20 = vpop.eup %3166  ;;  %v1707_v23 = vsub.f32 1.5, %v1706_v9  ;;  %v3802_v24 = vmax.f32 %v1604_v15, 1e-24  ;;  %v1600_v27 = vpop.xlane.xlu0 %1599  ;;  %v3809_v52 = vmax.f32 %v1602_v18, 1e-24 }
 0x3cd   : > { %v3169_v29 = vpop.eup %3168  ;;  %v1728_v32 = vmul.f32 %v3161_v44, %v1727_v11  ;;  %v1687_v33 = vsub.f32 1.5, %v1686_v14  ;;  %v1734_v38 = vmul.f32 %v3167_v20, %v3793_v45  ;;  %vm1740_vm10 = vweird.f32 %v3167_v20 }
 0x3ce   : > { %v3171_v41 = vpop.eup %3170  ;;  %v1708_v42 = vmul.f32 %v3163_v51, %v1707_v23  ;;  %v1714_v48 = vmul.f32 %v3169_v29, %v3795_v47  ;;  %3172 = vrsqrt.f32 %v3802_v24  ;;  %v3827_v39 = vmax.f32 %v1600_v27, 1e-24  ;;  %vm1741_vm13 = vmor %vm1739_vm9, %vm1740_vm10 }
 0x3cf   : > { %v1732_v60 = vsel %vm1731_vm6, %v3161_v44, %v1728_v32  ;;  %v1688_v61 = vmul.f32 %v3165_v57, %v1687_v33  ;;  %v1735_v0 = vmul.f32 %v3167_v20, %v1734_v38  ;;  %v1694_v2 = vmul.f32 %v3171_v41, %v3797_v55 }
 0x3d0   : > { %v3815_v5 = vmul.f32 %v1732_v60, %v3646_v10  ;;  %v1712_v35 = vsel %vm1711_vm7, %v3163_v51, %v1708_v42  ;;  %v1715_v6 = vmul.f32 %v3169_v29, %v1714_v48  ;;  %3174 = vrsqrt.f32 %v3809_v52 }
 0x3d1   : > { %v3820_v9 = vmul.f32 %v1712_v35, %v3638_v62  ;;  %v1692_v11 = vsel %vm1691_vm8, %v3165_v57, %v1688_v61  ;;  %v1736_v44 = vmul.f32 0.5, %v1735_v0  ;;  %v1695_v14 = vmul.f32 %v3171_v41, %v1694_v2 }
 0x3d2   : > { %v3823_v36 = vmul.f32 %v1692_v11, %v3630_v50  ;;  %v1716_v15 = vmul.f32 0.5, %v1715_v6  ;;  %vm1720_vm11 = vweird.f32 %v3169_v29  ;;  %vm1700_vm12 = vweird.f32 %v3171_v41 }
 0x3d3   : > { %v1737_v10 = vsub.f32 1.5, %v1736_v44  ;;  %v1696_v51 = vmul.f32 0.5, %v1695_v14  ;;  %v1610_v18 = vpop.xlane.xlu2 %1609  ;;  %v1608_v23 = vpop.xlane.xlu1 %1607  ;;  %3176 = vrsqrt.f32 %v3827_v39  ;;  %vm1721_vm0 = vmor %vm1719_vm14, %vm1720_vm11  ;;  %vm1769_vm2 = vweird.f32 %v3802_v24 }
 0x3d4   : > { %v3173_v62 = vpop.eup %3172  ;;  %v1717_v32 = vsub.f32 1.5, %v1716_v15  ;;  %v3829_v57 = vmax.f32 %v1610_v18, 1e-24  ;;  %v3831_v33 = vmax.f32 %v1608_v23, 1e-24  ;;  %v1606_v50 = vpop.xlane.xlu0 %1605  ;;  %vm1701_vm1 = vmor %vm1699_vm15, %vm1700_vm12  ;;  %vm1759_vm5 = vweird.f32 %v3809_v52 }
 0x3d5   : > { %v1738_v38 = vmul.f32 %v3167_v20, %v1737_v10  ;;  %v1697_v42 = vsub.f32 1.5, %v1696_v51  ;;  %v1764_v48 = vmul.f32 %v3173_v62, %v3802_v24  ;;  %v3853_v44 = vmax.f32 %v1606_v50, 1e-24 }
 0x3d6   : > { %v1718_v27 = vmul.f32 %v3169_v29, %v1717_v32  ;;  %3178 = vrsqrt.f32 %v3829_v57  ;;  %v3175_v2 = vpop.eup %3174  ;;  %vm1770_vm3 = vweird.f32 %v3173_v62  ;;  %vm1749_vm7 = vweird.f32 %v3827_v39 }
 0x3d7   : > { %v1742_v60 = vsel %vm1741_vm13, %v3167_v20, %v1738_v38  ;;  %v1698_v61 = vmul.f32 %v3171_v41, %v1697_v42  ;;  %v1765_v0 = vmul.f32 %v3173_v62, %v1764_v48  ;;  %3180 = vrsqrt.f32 %v3831_v33  ;;  %vm1771_vm4 = vmor %vm1769_vm2, %vm1770_vm3 }
 0x3d8   : > { %v3842_v35 = vmul.f32 %v1742_v60, %v3650_v16  ;;  %v1722_v6 = vsel %vm1721_vm0, %v3169_v29, %v1718_v27  ;;  %v1754_v20 = vmul.f32 %v3175_v2, %v3809_v52  ;;  %3182 = vrsqrt.f32 %v3853_v44 }
 0x3d9   : > { %v3847_v45 = vmul.f32 %v1722_v6, %v3642_v4  ;;  %v1702_v47 = vsel %vm1701_vm1, %v3171_v41, %v1698_v61  ;;  %v1766_v55 = vmul.f32 0.5, %v1765_v0  ;;  %v3177_v10 = vpop.eup %3176  ;;  %vm1760_vm6 = vweird.f32 %v3175_v2 }
 0x3da   : > { %v3851_v11 = vmul.f32 %v1702_v47, %v3634_v56  ;;  %v1755_v16 = vmul.f32 %v3175_v2, %v1754_v20  ;;  %v1744_v32 = vmul.f32 %v3177_v10, %v3827_v39  ;;  %vm1799_vm8 = vweird.f32 %v3829_v57  ;;  %vm1761_vm9 = vmor %vm1759_vm5, %vm1760_vm6 }
 0x3db   : > { %v1767_v14 = vsub.f32 1.5, %v1766_v55  ;;  %v1616_v29 = vpop.xlane.xlu2 %1615  ;;  %v1614_v15 = vpop.xlane.xlu1 %1613  ;;  %vm1750_vm10 = vweird.f32 %v3177_v10  ;;  %vm1789_vm14 = vweird.f32 %v3831_v33  ;;  %vm1779_vm15 = vweird.f32 %v3853_v44 }
 0x3dc   : > { %v3857_v4 = vmax.f32 %v1616_v29, 1e-24  ;;  %v3859_v41 = vmax.f32 %v1614_v15, 1e-24  ;;  %v1612_v51 = vpop.xlane.xlu0 %1611  ;;  %v3179_v18 = vpop.eup %3178  ;;  %v1756_v23 = vmul.f32 0.5, %v1755_v16  ;;  %v1745_v27 = vmul.f32 %v3177_v10, %v1744_v32  ;;  %vm1751_vm13 = vmor %vm1749_vm7, %vm1750_vm10 }
 0x3dd   : > { %v1768_v56 = vmul.f32 %v3173_v62, %v1767_v14  ;;  %v3181_v50 = vpop.eup %3180  ;;  %v1794_v38 = vmul.f32 %v3179_v18, %v3829_v57  ;;  %vm1800_vm11 = vweird.f32 %v3179_v18 }
 0x3de   : > { %3184 = vrsqrt.f32 %v3857_v4  ;;  %v1757_v48 = vsub.f32 1.5, %v1756_v23  ;;  %v1784_v60 = vmul.f32 %v3181_v50, %v3831_v33  ;;  %v1746_v6 = vmul.f32 0.5, %v1745_v27  ;;  %v3874_v55 = vpop.eup %3182  ;;  %vm1801_vm0 = vmor %vm1799_vm8, %vm1800_vm11 }
 0x3df   : > { %v1772_v42 = vsel %vm1771_vm4, %v3173_v62, %v1768_v56  ;;  %v1795_v0 = vmul.f32 %v3179_v18, %v1794_v38  ;;  %3186 = vrsqrt.f32 %v3859_v41  ;;  %v1774_v29 = vmul.f32 %v3874_v55, %v3853_v44 }
 0x3e0   : > { %v3869_v61 = vmul.f32 %v1772_v42, %v3662_v34  ;;  %v1758_v24 = vmul.f32 %v3175_v2, %v1757_v48  ;;  %v1785_v47 = vmul.f32 %v3181_v50, %v1784_v60  ;;  %v3879_v34 = vmax.f32 %v1612_v51, 1e-24 }
 0x3e1   : > { %v1796_v62 = vmul.f32 0.5, %v1795_v0  ;;  %v1747_v14 = vsub.f32 1.5, %v1746_v6  ;;  %vm1790_vm12 = vweird.f32 %v3181_v50  ;;  %vm1780_vm2 = vweird.f32 %v3874_v55 }
 0x3e2   : > { %v1762_v20 = vsel %vm1761_vm9, %v3175_v2, %v1758_v24  ;;  %v1786_v16 = vmul.f32 0.5, %v1785_v47  ;;  %3188 = vrsqrt.f32 %v3879_v34  ;;  %v1775_v2 = vmul.f32 %v3874_v55, %v1774_v29  ;;  %vm1791_vm1 = vmor %vm1789_vm14, %vm1790_vm12 }
 0x3e3   : > { %v1622_v15 = vpop.xlane.xlu2 %1621  ;;  %v1620_v56 = vpop.xlane.xlu1 %1619  ;;  %v3884_v32 = vmul.f32 %v1762_v20, %v3658_v28  ;;  %v1797_v38 = vsub.f32 1.5, %v1796_v62  ;;  %v1748_v42 = vmul.f32 %v3177_v10, %v1747_v14  ;;  %vm1829_vm3 = vweird.f32 %v3857_v4  ;;  %vm1781_vm5 = vmor %vm1779_vm15, %vm1780_vm2 }
 0x3e4   : > { %v3185_v23 = vpop.eup %3184  ;;  %v1618_v52 = vpop.xlane.xlu0 %1617  ;;  %v1787_v51 = vsub.f32 1.5, %v1786_v16  ;;  %v3894_v28 = vmax.f32 %v1622_v15, 1e-24  ;;  %v1776_v6 = vmul.f32 0.5, %v1775_v2  ;;  %vm1819_vm8 = vweird.f32 %v3859_v41 }
 0x3e5   : > { %v1824_v48 = vmul.f32 %v3185_v23, %v3857_v4  ;;  %v3187_v27 = vpop.eup %3186  ;;  %v1798_v60 = vmul.f32 %v3179_v18, %v1797_v38  ;;  %v1752_v0 = vsel %vm1751_vm13, %v3177_v10, %v1748_v42  ;;  %vm1830_vm4 = vweird.f32 %v3185_v23 }
 0x3e6   : > { %v1788_v24 = vmul.f32 %v3181_v50, %v1787_v51  ;;  %v3900_v62 = vmul.f32 %v1752_v0, %v3654_v22  ;;  %v1814_v33 = vmul.f32 %v3187_v27, %v3859_v41  ;;  %v1777_v14 = vsub.f32 1.5, %v1776_v6  ;;  %vm1831_vm6 = vmor %vm1829_vm3, %vm1830_vm4 }
 0x3e7   : > { %v1825_v47 = vmul.f32 %v3185_v23, %v1824_v48  ;;  %v1802_v39 = vsel %vm1801_vm0, %v3179_v18, %v1798_v60  ;;  %3190 = vrsqrt.f32 %v3894_v28  ;;  %v3921_v51 = vmax.f32 %v1618_v52, 1e-24 }
 0x3e8   : > { %v3906_v20 = vmul.f32 %v1802_v39, %v3674_v54  ;;  %v1792_v10 = vsel %vm1791_vm1, %v3181_v50, %v1788_v24  ;;  %v3189_v16 = vpop.eup %3188  ;;  %v1815_v22 = vmul.f32 %v3187_v27, %v1814_v33  ;;  %v1778_v18 = vmul.f32 %v3874_v55, %v1777_v14 }
 0x3e9   : > { %v1826_v57 = vmul.f32 0.5, %v1825_v47  ;;  %v3909_v29 = vmul.f32 %v1792_v10, %v3670_v46  ;;  %v1804_v38 = vmul.f32 %v3189_v16, %v3879_v34  ;;  %v3919_v50 = vmax.f32 %v1620_v56, 1e-24 }
 0x3ea   : > { %v1816_v46 = vmul.f32 0.5, %v1815_v22  ;;  %v1782_v48 = vsel %vm1781_vm5, %v3874_v55, %v1778_v18  ;;  %vm1820_vm7 = vweird.f32 %v3187_v27  ;;  %vm1810_vm10 = vweird.f32 %v3189_v16 }
 0x3eb   : > { %v1827_v15 = vsub.f32 1.5, %v1826_v57  ;;  %v1628_v54 = vpop.xlane.xlu2 %1627  ;;  %v1626_v42 = vpop.xlane.xlu1 %1625  ;;  %v1805_v0 = vmul.f32 %v3189_v16, %v1804_v38  ;;  %v3927_v6 = vmul.f32 %v1782_v48, %v3666_v40  ;;  %3192 = vrsqrt.f32 %v3919_v50  ;;  %vm1821_vm9 = vmor %vm1819_vm8, %vm1820_vm7 }
 0x3ec   : > { %v1624_v2 = vpop.xlane.xlu0 %1623  ;;  %v3924_v24 = vmax.f32 %v1628_v54, 1e-24  ;;  %v1817_v44 = vsub.f32 1.5, %v1816_v46  ;;  %3194 = vrsqrt.f32 %v3921_v51  ;;  %vm1809_vm11 = vweird.f32 %v3879_v34 }
 0x3ed   : > { %v1828_v60 = vmul.f32 %v3185_v23, %v1827_v15  ;;  %v1806_v52 = vmul.f32 0.5, %v1805_v0  ;;  %v3933_v47 = vpop.eup %3190  ;;  %v3945_v10 = vmax.f32 %v1624_v2, 1e-24  ;;  %vm1811_vm12 = vmor %vm1809_vm11, %vm1810_vm10  ;;  %vm1859_vm13 = vweird.f32 %v3894_v28 }
 0x3ee   : > { %v1818_v39 = vmul.f32 %v3187_v27, %v1817_v44  ;;  %3196 = vrsqrt.f32 %v3924_v24  ;;  %v1854_v4 = vmul.f32 %v3933_v47, %v3894_v28  ;;  %vm1849_vm14 = vweird.f32 %v3919_v50 }
 0x3ef   : > { %v1832_v56 = vsel %vm1831_vm6, %v3185_v23, %v1828_v60  ;;  %v1807_v40 = vsub.f32 1.5, %v1806_v52  ;;  %v3942_v23 = vmax.f32 %v1626_v42, 1e-24  ;;  %vm1839_vm15 = vweird.f32 %v3921_v51 }
 0x3f0   : > { %v3936_v55 = vmul.f32 %v1832_v56, %v3686_v17  ;;  %v1822_v33 = vsel %vm1821_vm9, %v3187_v27, %v1818_v39  ;;  %v1855_v41 = vmul.f32 %v3933_v47, %v1854_v4  ;;  %vm1860_vm0 = vweird.f32 %v3933_v47 }
 0x3f1   : > { %v3948_v17 = vmul.f32 %v1822_v33, %v3682_v8  ;;  %v1808_v14 = vmul.f32 %v3189_v16, %v1807_v40  ;;  %3198 = vrsqrt.f32 %v3942_v23  ;;  %v3952_v18 = vpop.eup %3192  ;;  %vm1889_vm2 = vweird.f32 %v3924_v24  ;;  %vm1861_vm4 = vmor %vm1859_vm13, %vm1860_vm0 }
 0x3f2   : > { %3200 = vrsqrt.f32 %v3945_v10  ;;  %v3958_v15 = vpop.eup %3194  ;;  %v1856_v38 = vmul.f32 0.5, %v1855_v41  ;;  %v1844_v54 = vmul.f32 %v3952_v18, %v3919_v50  ;;  %vm1850_vm1 = vweird.f32 %v3952_v18 }
 0x3f3   : > { %v1634_v57 = vpop.xlane.xlu2 %1633  ;;  %v1632_v22 = vpop.xlane.xlu1 %1631  ;;  %v1812_v8 = vsel %vm1811_vm12, %v3189_v16, %v1808_v14  ;;  %v1834_v2 = vmul.f32 %v3958_v15, %v3921_v51  ;;  %vm1840_vm3 = vweird.f32 %v3958_v15  ;;  %vm1879_vm6 = vweird.f32 %v3942_v23  ;;  %vm1851_vm8 = vmor %vm1849_vm14, %vm1850_vm1 }
 0x3f4   : > { %v3956_v34 = vmax.f32 %v1634_v57, 1e-24  ;;  %v1630_v27 = vpop.xlane.xlu0 %1629  ;;  %v3963_v42 = vpop.eup %3196  ;;  %v3966_v46 = vmul.f32 %v1812_v8, %v3678_v63  ;;  %v1857_v48 = vsub.f32 1.5, %v1856_v38  ;;  %v1845_v16 = vmul.f32 %v3952_v18, %v1844_v54  ;;  %vm1841_vm11 = vmor %vm1839_vm15, %vm1840_vm3 }
 0x3f5   : > { %v1884_v60 = vmul.f32 %v3963_v42, %v3924_v24  ;;  %v1835_v63 = vmul.f32 %v3958_v15, %v1834_v2  ;;  %v3979_v0 = vmax.f32 %v1632_v22, 1e-24  ;;  %vm1890_vm5 = vweird.f32 %v3963_v42 }
 0x3f6   : > { %3202 = vrsqrt.f32 %v3956_v34  ;;  %v1858_v56 = vmul.f32 %v3933_v47, %v1857_v48  ;;  %v1846_v52 = vmul.f32 0.5, %v1845_v16  ;;  %vm1869_vm7 = vweird.f32 %v3945_v10  ;;  %vm1891_vm12 = vmor %vm1889_vm2, %vm1890_vm5 }
 0x3f7   : > { %v3981_v44 = vpop.eup %3198  ;;  %v1885_v39 = vmul.f32 %v3963_v42, %v1884_v60  ;;  %v1836_v4 = vmul.f32 0.5, %v1835_v63  ;;  %3204 = vrsqrt.f32 %v3979_v0  ;;  %v4003_v48 = vmax.f32 %v1630_v27, 1e-24 }
 0x3f8   : > { %v3986_v40 = vpop.eup %3200  ;;  %v1874_v33 = vmul.f32 %v3981_v44, %v3942_v23  ;;  %v1862_v14 = vsel %vm1861_vm4, %v3933_v47, %v1858_v56  ;;  %v1847_v41 = vsub.f32 1.5, %v1846_v52  ;;  %vm1880_vm9 = vweird.f32 %v3981_v44 }
 0x3f9   : > { %v1886_v57 = vmul.f32 0.5, %v1885_v39  ;;  %v1864_v22 = vmul.f32 %v3986_v40, %v3945_v10  ;;  %v4000_v38 = vmul.f32 %v1862_v14, %v3636_v59  ;;  %v1837_v54 = vsub.f32 1.5, %v1836_v4  ;;  %vm1881_vm14 = vmor %vm1879_vm6, %vm1880_vm9 }
 0x3fa   : > { %v1875_v2 = vmul.f32 %v3981_v44, %v1874_v33  ;;  %v1848_v47 = vmul.f32 %v3952_v18, %v1847_v41  ;;  %vm1870_vm10 = vweird.f32 %v3986_v40  ;;  %3206 = vrsqrt.f32 %v4003_v48 }
 0x3fb   : > { %v1638_v28 = vpop.xlane.xlu1 %1637  ;;  %v1640_v16 = vpop.xlane.xlu2 %1639  ;;  %v1887_v63 = vsub.f32 1.5, %v1886_v57  ;;  %v1865_v56 = vmul.f32 %v3986_v40, %v1864_v22  ;;  %v1838_v59 = vmul.f32 %v3958_v15, %v1837_v54  ;;  %vm1919_vm13 = vweird.f32 %v3956_v34  ;;  %vm1871_vm0 = vmor %vm1869_vm7, %vm1870_vm10 }
 0x3fc   : > { %v3203_v8 = vpop.eup %3202  ;;  %v1636_v60 = vpop.xlane.xlu0 %1635  ;;  %v1876_v39 = vmul.f32 0.5, %v1875_v2  ;;  %v1852_v27 = vsel %vm1851_vm8, %v3952_v18, %v1848_v47  ;;  %vm1909_vm3 = vweird.f32 %v3979_v0  ;;  %vm1899_vm6 = vweird.f32 %v4003_v48 }
 0x3fd   : > { %v1914_v52 = vmul.f32 %v3203_v8, %v3956_v34  ;;  %v1888_v4 = vmul.f32 %v3963_v42, %v1887_v63  ;;  %v1866_v33 = vmul.f32 0.5, %v1865_v56  ;;  %v3205_v50 = vpop.eup %3204  ;;  %v4022_v41 = vmul.f32 %v1852_v27, %v3632_v53 }
 0x3fe   : > { %v1842_v57 = vsel %vm1841_vm11, %v3958_v15, %v1838_v59  ;;  %v1877_v18 = vsub.f32 1.5, %v1876_v39  ;;  %v1904_v24 = vmul.f32 %v3205_v50, %v3979_v0  ;;  %vm1920_vm15 = vweird.f32 %v3203_v8 }
 0x3ff   : > { %v1915_v14 = vmul.f32 %v3203_v8, %v1914_v52  ;;  %v4031_v51 = vmul.f32 %v1842_v57, %v3690_v26  ;;  %v1892_v22 = vsel %vm1891_vm12, %v3963_v42, %v1888_v4  ;;  %v1867_v54 = vsub.f32 1.5, %v1866_v33  ;;  %vm1921_vm1 = vmor %vm1919_vm13, %vm1920_vm15 }
 0x400   : > { %v4035_v53 = vmul.f32 %v1892_v22, %v3648_v13  ;;  %v1878_v15 = vmul.f32 %v3981_v44, %v1877_v18  ;;  %v4045_v42 = vmax.f32 %v1640_v16, 1e-24  ;;  %v1905_v56 = vmul.f32 %v3205_v50, %v1904_v24 }
 0x401   : > { %v1916_v2 = vmul.f32 0.5, %v1915_v14  ;;  %v1868_v26 = vmul.f32 %v3986_v40, %v1867_v54  ;;  %v4052_v52 = vmax.f32 %v1638_v28, 1e-24  ;;  %v4054_v59 = vmax.f32 %v1636_v60, 1e-24 }
 0x402   : > { %v1882_v13 = vsel %vm1881_vm14, %v3981_v44, %v1878_v15  ;;  %3208 = vrsqrt.f32 %v4045_v42  ;;  %v3207_v44 = vpop.eup %3206  ;;  %v1906_v10 = vmul.f32 0.5, %v1905_v56  ;;  %vm1910_vm2 = vweird.f32 %v3205_v50 }
 0x403   : > { %v1917_v47 = vsub.f32 1.5, %v1916_v2  ;;  %v1644_v63 = vpop.xlane.xlu1 %1643  ;;  %v4057_v39 = vmul.f32 %v1882_v13, %v3644_v7  ;;  %v1872_v16 = vsel %vm1871_vm0, %v3986_v40, %v1868_v26  ;;  %3210 = vrsqrt.f32 %v4052_v52  ;;  %v1646_v28 = vpop.xlane.xlu2 %1645  ;;  %vm1911_vm4 = vmor %vm1909_vm3, %vm1910_vm2 }
 0x404   : > { %v1642_v23 = vpop.xlane.xlu0 %1641  ;;  %v4062_v4 = vmul.f32 %v1872_v16, %v3640_v1  ;;  %v1894_v7 = vmul.f32 %v3207_v44, %v4003_v48  ;;  %v1907_v33 = vsub.f32 1.5, %v1906_v10  ;;  %3212 = vrsqrt.f32 %v4054_v59 }
 0x405   : > { %v1918_v27 = vmul.f32 %v3203_v8, %v1917_v47  ;;  %v4073_v14 = vmax.f32 %v1646_v28, 1e-24  ;;  %v4075_v57 = vmax.f32 %v1644_v63, 1e-24  ;;  %v4078_v18 = vmax.f32 %v1642_v23, 1e-24 }
 0x406   : > { %v1895_v1 = vmul.f32 %v3207_v44, %v1894_v7  ;;  %v1908_v34 = vmul.f32 %v3205_v50, %v1907_v33  ;;  %vm1900_vm5 = vweird.f32 %v3207_v44  ;;  %vm1949_vm7 = vweird.f32 %v4045_v42 }
 0x407   : > { %v1922_v60 = vsel %vm1921_vm1, %v3203_v8, %v1918_v27  ;;  %3214 = vrsqrt.f32 %v4073_v14  ;;  %vm1901_vm8 = vmor %vm1899_vm6, %vm1900_vm5  ;;  %vm1939_vm9 = vweird.f32 %v4052_v52  ;;  %vm1929_vm10 = vweird.f32 %v4054_v59 }
 0x408   : > { %v4070_v40 = vmul.f32 %v1922_v60, %v3660_v31  ;;  %v3209_v8 = vpop.eup %3208  ;;  %v1896_v22 = vmul.f32 0.5, %v1895_v1  ;;  %v1912_v2 = vsel %vm1911_vm4, %v3205_v50, %v1908_v34  ;;  %3216 = vrsqrt.f32 %v4075_v57 }
 0x409   : > { %v3211_v54 = vpop.eup %3210  ;;  %v1944_v15 = vmul.f32 %v3209_v8, %v4045_v42  ;;  %v4084_v24 = vmul.f32 %v1912_v2, %v3656_v25  ;;  %3218 = vrsqrt.f32 %v4078_v18  ;;  %vm1950_vm11 = vweird.f32 %v3209_v8 }
 0x40a   : > { %v1897_v26 = vsub.f32 1.5, %v1896_v22  ;;  %v1934_v0 = vmul.f32 %v3211_v54, %v4052_v52  ;;  %v3213_v63 = vpop.eup %3212  ;;  %vm1940_vm12 = vweird.f32 %v3211_v54  ;;  %vm1951_vm14 = vmor %vm1949_vm7, %vm1950_vm11  ;;  %vm1979_vm0 = vweird.f32 %v4073_v14 }
 0x40b   : > { %v1650_v31 = vpop.xlane.xlu1 %1649  ;;  %v1945_v13 = vmul.f32 %v3209_v8, %v1944_v15  ;;  %v1924_v25 = vmul.f32 %v3213_v63, %v4054_v59  ;;  %vm1930_vm13 = vweird.f32 %v3213_v63  ;;  %vm1941_vm15 = vmor %vm1939_vm9, %vm1940_vm12  ;;  %vm1969_vm5 = vweird.f32 %v4075_v57 }
 0x40c   : > { %v1648_v47 = vpop.xlane.xlu0 %1647  ;;  %v4089_v56 = vmax.f32 %v1650_v31, 1e-24  ;;  %v1898_v50 = vmul.f32 %v3207_v44, %v1897_v26  ;;  %v1935_v23 = vmul.f32 %v3211_v54, %v1934_v0  ;;  %vm1931_vm2 = vmor %vm1929_vm10, %vm1930_vm13 }
 0x40d   : > { %v1946_v16 = vmul.f32 0.5, %v1945_v13  ;;  %v4095_v27 = vmax.f32 %v1648_v47, 1e-24  ;;  %v3215_v48 = vpop.eup %3214  ;;  %v1925_v60 = vmul.f32 %v3213_v63, %v1924_v25 }
 0x40e   : > { %3220 = vrsqrt.f32 %v4089_v56  ;;  %v1902_v10 = vsel %vm1901_vm8, %v3207_v44, %v1898_v50  ;;  %v1936_v28 = vmul.f32 0.5, %v1935_v23  ;;  %v3217_v7 = vpop.eup %3216  ;;  %v1974_v34 = vmul.f32 %v3215_v48, %v4073_v14 }
 0x40f   : > { %v4099_v33 = vmul.f32 %v1902_v10, %v3652_v19  ;;  %v1947_v1 = vsub.f32 1.5, %v1946_v16  ;;  %v1926_v31 = vmul.f32 0.5, %v1925_v60  ;;  %v1964_v2 = vmul.f32 %v3217_v7, %v4075_v57  ;;  %v3219_v15 = vpop.eup %3218 }
 0x410   : > { %v1937_v22 = vsub.f32 1.5, %v1936_v28  ;;  %v1975_v44 = vmul.f32 %v3215_v48, %v1974_v34  ;;  %3222 = vrsqrt.f32 %v4095_v27  ;;  %v1954_v13 = vmul.f32 %v3219_v15, %v4078_v18 }
 0x411   : > { %v1948_v26 = vmul.f32 %v3209_v8, %v1947_v1  ;;  %v1927_v0 = vsub.f32 1.5, %v1926_v31  ;;  %v1965_v47 = vmul.f32 %v3217_v7, %v1964_v2  ;;  %vm1980_vm1 = vweird.f32 %v3215_v48 }
 0x412   : > { %v1938_v19 = vmul.f32 %v3211_v54, %v1937_v22  ;;  %v1976_v25 = vmul.f32 0.5, %v1975_v44  ;;  %v1955_v52 = vmul.f32 %v3219_v15, %v1954_v13  ;;  %vm1970_vm3 = vweird.f32 %v3217_v7  ;;  %vm1981_vm4 = vmor %vm1979_vm0, %vm1980_vm1 }
 0x413   : > { %v1952_v23 = vsel %vm1951_vm14, %v3209_v8, %v1948_v26  ;;  %v1928_v10 = vmul.f32 %v3213_v63, %v1927_v0  ;;  %v1966_v28 = vmul.f32 0.5, %v1965_v47  ;;  %vm1971_vm6 = vmor %vm1969_vm5, %vm1970_vm3  ;;  %vm1960_vm7 = vweird.f32 %v3219_v15 }
 0x414   : > { %v3221_v50 = vpop.eup %3220  ;;  %v4112_v16 = vmul.f32 %v1952_v23, %v3672_v49  ;;  %v1942_v42 = vsel %vm1941_vm15, %v3211_v54, %v1938_v19  ;;  %v1977_v8 = vsub.f32 1.5, %v1976_v25  ;;  %v1956_v2 = vmul.f32 0.5, %v1955_v52 }
 0x415   : > { %v4115_v60 = vmul.f32 %v1942_v42, %v3668_v43  ;;  %v1994_v1 = vmul.f32 %v3221_v50, %v4089_v56  ;;  %v1932_v34 = vsel %vm1931_vm2, %v3213_v63, %v1928_v10  ;;  %v1967_v22 = vsub.f32 1.5, %v1966_v28 }
 0x416   : > { %v3223_v31 = vpop.eup %3222  ;;  %v4122_v49 = vmul.f32 %v1932_v34, %v3664_v37  ;;  %v1978_v54 = vmul.f32 %v3215_v48, %v1977_v8  ;;  %v1957_v63 = vsub.f32 1.5, %v1956_v2  ;;  %vm1959_vm8 = vweird.f32 %v4078_v18 }
 0x417   : > { %v1995_v26 = vmul.f32 %v3221_v50, %v1994_v1  ;;  %v1968_v43 = vmul.f32 %v3217_v7, %v1967_v22  ;;  %v1984_v59 = vmul.f32 %v3223_v31, %v4095_v27  ;;  %vm2000_vm9 = vweird.f32 %v3221_v50  ;;  %vm1961_vm10 = vmor %vm1959_vm8, %vm1960_vm7 }
 0x418   : > { %v1982_v44 = vsel %vm1981_vm4, %v3215_v48, %v1978_v54  ;;  %v1958_v13 = vmul.f32 %v3219_v15, %v1957_v63  ;;  %vm1999_vm11 = vweird.f32 %v4089_v56  ;;  %vm1990_vm13 = vweird.f32 %v3223_v31 }
 0x419   : > { %v1996_v19 = vmul.f32 0.5, %v1995_v26  ;;  %v4130_v37 = vmul.f32 %v1982_v44, %v3684_v12  ;;  %v1972_v0 = vsel %vm1971_vm6, %v3217_v7, %v1968_v43  ;;  %v1985_v47 = vmul.f32 %v3223_v31, %v1984_v59  ;;  %vm2001_vm12 = vmor %vm1999_vm11, %vm2000_vm9 }
 0x41a   : > { %v4134_v14 = vmul.f32 %v1972_v0, %v3680_v3  ;;  %v1962_v48 = vsel %vm1961_vm10, %v3219_v15, %v1958_v13  ;;  %vm1989_vm14 = vweird.f32 %v4095_v27 }
 0x41b   : > { %v1997_v23 = vsub.f32 1.5, %v1996_v19  ;;  %v1986_v57 = vmul.f32 0.5, %v1985_v47  ;;  %v4138_v42 = vmul.f32 %v1962_v48, %v3676_v58  ;;  %vm1991_vm15 = vmor %vm1989_vm14, %vm1990_vm13 }
 0x41d   : > { %v1998_v25 = vmul.f32 %v3221_v50, %v1997_v23  ;;  %v1987_v12 = vsub.f32 1.5, %v1986_v57 }
 0x41e   : > { %2038 = sbr.rel (%p2508_p3) target bundleno = 1094 (0x446), region = 80 }
 0x41f   : > { %v2002_v18 = vsel %vm2001_vm12, %v3221_v50, %v1998_v25  ;;  %v1988_v3 = vmul.f32 %v3223_v31, %v1987_v12 }
 0x420   : > { %v4141_v7 = vmul.f32 %v2002_v18, %v3692_v30 }
 0x421   : > { %v1992_v10 = vsel %vm1991_vm15, %v3223_v31, %v1988_v3 }
 0x422   : > { %v4145_v15 = vmul.f32 %v1992_v10, %v3688_v21 }
 0x423   : > { %v2039_v58 = vld [vmem:[#allocation9] sm:$0xff]  ;;  %v2040_v56 = vld [vmem:[#allocation9 + $0x8] sm:$0xff]  ;;  %v2041_v28 = vld [vmem:[#allocation9 + $0x10] sm:$0xff] }
 0x424   : > { %v2071_v8 = vadd.f32 %v2039_v58, %v3823_v36  ;;  %v2072_v50 = vadd.f32 %v2040_v56, %v3851_v11  ;;  %v2073_v30 = vadd.f32 %v2041_v28, %v3820_v9  ;;  %v2042_v52 = vld [vmem:[#allocation9 + $0x18] sm:$0xff]  ;;  %v2043_v1 = vld [vmem:[#allocation9 + $0x20] sm:$0xff]  ;;  %v2044_v27 = vld [vmem:[#allocation9 + $0x28] sm:$0xff] }
 0x425   : > { %v2074_v34 = vadd.f32 %v2042_v52, %v3847_v45  ;;  %v2045_v22 = vld [vmem:[#allocation9 + $0x30] sm:$0xff]  ;;  %v2075_v21 = vadd.f32 %v2043_v1, %v3815_v5  ;;  %v2046_v31 = vld [vmem:[#allocation9 + $0x38] sm:$0xff]  ;;  %v2076_v54 = vadd.f32 %v2044_v27, %v3842_v35  ;;  %v2047_v2 = vld [vmem:[#allocation9 + $0x40] sm:$0xff] }
 0x426   : > { %2104 = vst [vmem:[#allocation4 + $0x18] sm:$0xff] %v2071_v8  ;;  %v2077_v26 = vadd.f32 %v2045_v22, %v3900_v62  ;;  %v2048_v43 = vld [vmem:[#allocation9 + $0x48] sm:$0xff]  ;;  %v2078_v59 = vadd.f32 %v2046_v31, %v3884_v32  ;;  %v2049_v44 = vld [vmem:[#allocation9 + $0x50] sm:$0xff]  ;;  %v2079_v63 = vadd.f32 %v2047_v2, %v3869_v61  ;;  %v2050_v19 = vld [vmem:[#allocation9 + $0x58] sm:$0xff] }
 0x427   : > { %2105 = vst [vmem:[#allocation4 + $0x90] sm:$0xff] %v2072_v50  ;;  %v2080_v0 = vadd.f32 %v2048_v43, %v3927_v6  ;;  %v2051_v47 = vld [vmem:[#allocation9 + $0x60] sm:$0xff]  ;;  %v2081_v13 = vadd.f32 %v2049_v44, %v3909_v29  ;;  %v2052_v23 = vld [vmem:[#allocation9 + $0x68] sm:$0xff]  ;;  %v2082_v57 = vadd.f32 %v2050_v19, %v3906_v20  ;;  %v2053_v48 = vld [vmem:[#allocation9 + $0x70] sm:$0xff] }
 0x428   : > { %2106 = vst [vmem:[#allocation4 + $0x48] sm:$0xff] %v2073_v30  ;;  %v2083_v25 = vadd.f32 %v2051_v47, %v3966_v46  ;;  %v2054_v12 = vld [vmem:[#allocation9 + $0x78] sm:$0xff]  ;;  %v2084_v18 = vadd.f32 %v2052_v23, %v3948_v17  ;;  %v2055_v3 = vld [vmem:[#allocation9 + $0x80] sm:$0xff]  ;;  %v2085_v10 = vadd.f32 %v2053_v48, %v3936_v55  ;;  %v2056_v58 = vld [vmem:[#allocation9 + $0x88] sm:$0xff] }
 0x429   : > { %2107 = vst [vmem:[#allocation4 + $0x80] sm:$0xff] %v2074_v34  ;;  %v2086_v56 = vadd.f32 %v2054_v12, %v4031_v51  ;;  %v2057_v28 = vld [vmem:[#allocation9 + $0x90] sm:$0xff]  ;;  %v2087_v8 = vadd.f32 %v2055_v3, %v4022_v41  ;;  %v2058_v50 = vld [vmem:[#allocation9 + $0x98] sm:$0xff]  ;;  %v2088_v30 = vadd.f32 %v2056_v58, %v4000_v38  ;;  %v2059_v52 = vld [vmem:[#allocation9 + $0xa0] sm:$0xff] }
 0x42a   : > { %2108 = vst [vmem:[#allocation4 + $0x78] sm:$0xff] %v2075_v21  ;;  %v2089_v1 = vadd.f32 %v2057_v28, %v4062_v4  ;;  %v2060_v27 = vld [vmem:[#allocation9 + $0xa8] sm:$0xff]  ;;  %v2090_v34 = vadd.f32 %v2058_v50, %v4057_v39  ;;  %v2061_v22 = vld [vmem:[#allocation9 + $0xb0] sm:$0xff]  ;;  %v2091_v21 = vadd.f32 %v2059_v52, %v4035_v53  ;;  %v2062_v31 = vld [vmem:[#allocation9 + $0xb8] sm:$0xff] }
 0x42b   : > { %2109 = vst [vmem:[#allocation4 + $0x50] sm:$0xff] %v2076_v54  ;;  %v2092_v54 = vadd.f32 %v2060_v27, %v4099_v33  ;;  %v2063_v2 = vld [vmem:[#allocation9 + $0xc0] sm:$0xff]  ;;  %v2064_v43 = vld [vmem:[#allocation9 + $0xc8] sm:$0xff]  ;;  %v2065_v44 = vld [vmem:[#allocation9 + $0xd0] sm:$0xff] }
 0x42c   : > { %2110 = vst [vmem:[#allocation4 + $0xc8] sm:$0xff] %v2077_v26  ;;  %v2093_v26 = vadd.f32 %v2061_v22, %v4084_v24  ;;  %v2066_v19 = vld [vmem:[#allocation9 + $0xd8] sm:$0xff]  ;;  %v2067_v47 = vld [vmem:[#allocation9 + $0xe0] sm:$0xff]  ;;  %v2068_v23 = vld [vmem:[#allocation9 + $0xe8] sm:$0xff] }
 0x42d   : > { %2111 = vst [vmem:[#allocation4 + $0x70] sm:$0xff] %v2078_v59  ;;  %v2094_v59 = vadd.f32 %v2062_v31, %v4070_v40  ;;  %v2069_v48 = vld [vmem:[#allocation9 + $0xf0] sm:$0xff]  ;;  %v2070_v12 = vld [vmem:[#allocation9 + $0xf8] sm:$0xff] }
 0x42e   : > { %2112 = vst [vmem:[#allocation4 + $0xe0] sm:$0xff] %v2079_v63  ;;  %v2095_v63 = vadd.f32 %v2063_v2, %v4122_v49  ;;  %v2101_v3 = vadd.f32 %v2069_v48, %v4145_v15 }
 0x42f   : > { %2113 = vst [vmem:[#allocation4 + $0x30] sm:$0xff] %v2080_v0  ;;  %v2096_v0 = vadd.f32 %v2064_v43, %v4115_v60 }
 0x430   : > { %2114 = vst [vmem:[#allocation4 + $0xb8] sm:$0xff] %v2081_v13  ;;  %v2097_v13 = vadd.f32 %v2065_v44, %v4112_v16 }
 0x431   : > { %2115 = vst [vmem:[#allocation4 + $0xa0] sm:$0xff] %v2082_v57  ;;  %v2098_v57 = vadd.f32 %v2066_v19, %v4138_v42 }
 0x432   : > { %2116 = vst [vmem:[#allocation4 + $0xc0] sm:$0xff] %v2083_v25  ;;  %v2099_v25 = vadd.f32 %v2067_v47, %v4134_v14 }
 0x433   : > { %2117 = vst [vmem:[#allocation4 + $0xb0] sm:$0xff] %v2084_v18  ;;  %v2100_v18 = vadd.f32 %v2068_v23, %v4130_v37 }
 0x434   : > { %2118 = vst [vmem:[#allocation4 + $0x20] sm:$0xff] %v2085_v10  ;;  %v2102_v10 = vadd.f32 %v2070_v12, %v4141_v7 }
 0x435   : > { %2119 = vst [vmem:[#allocation4] sm:$0xff] %v2086_v56 }
 0x436   : > { %2120 = vst [vmem:[#allocation4 + $0x58] sm:$0xff] %v2087_v8 }
 0x437   : > { %2121 = vst [vmem:[#allocation4 + $0x40] sm:$0xff] %v2088_v30 }
 0x438   : > { %2122 = vst [vmem:[#allocation4 + $0xd8] sm:$0xff] %v2089_v1 }
 0x439   : > { %2123 = vst [vmem:[#allocation4 + $0x10] sm:$0xff] %v2090_v34 }
 0x43a   : > { %2124 = vst [vmem:[#allocation4 + $0x28] sm:$0xff] %v2091_v21 }
 0x43b   : > { %2125 = vst [vmem:[#allocation4 + $0xa8] sm:$0xff] %v2092_v54 }
 0x43c   : > { %2126 = vst [vmem:[#allocation4 + $0x98] sm:$0xff] %v2093_v26 }
 0x43d   : > { %2127 = vst [vmem:[#allocation4 + $0xd0] sm:$0xff] %v2094_v59 }
 0x43e   : > { %2128 = vst [vmem:[#allocation4 + $0xf0] sm:$0xff] %v2095_v63 }
 0x43f   : > { %2129 = vst [vmem:[#allocation4 + $0xf8] sm:$0xff] %v2096_v0 }
 0x440   : > { %2130 = vst [vmem:[#allocation4 + $0x68] sm:$0xff] %v2097_v13 }
 0x441   : > { %2131 = vst [vmem:[#allocation4 + $0x88] sm:$0xff] %v2098_v57 }
 0x442   : > { %2132 = vst [vmem:[#allocation4 + $0x8] sm:$0xff] %v2099_v25 }
 0x443   : > { %2133 = vst [vmem:[#allocation4 + $0x60] sm:$0xff] %v2100_v18 }
 0x444   : > { %2134 = vst [vmem:[#allocation4 + $0xe8] sm:$0xff] %v2101_v3 }
 0x445   : > { %2135 = vst [vmem:[#allocation4 + $0x38] sm:$0xff] %v2102_v10 }
 0x446 PF: > { %2139 = sbr.rel (%p2509_p1) target bundleno = 1134 (0x46e), region = 84 }
 0x44b   : > { %v2141_v58 = vld [vmem:[#allocation4 + $0x18] sm:$0xff]  ;;  %v2142_v56 = vld [vmem:[#allocation4 + $0x90] sm:$0xff]  ;;  %v2143_v28 = vld [vmem:[#allocation4 + $0x48] sm:$0xff] }
 0x44c   : > { %v2173_v8 = vadd.f32 %v2141_v58, %v3823_v36  ;;  %v2174_v50 = vadd.f32 %v2142_v56, %v3851_v11  ;;  %v2175_v30 = vadd.f32 %v2143_v28, %v3820_v9  ;;  %v2144_v52 = vld [vmem:[#allocation4 + $0x80] sm:$0xff]  ;;  %v2145_v1 = vld [vmem:[#allocation4 + $0x78] sm:$0xff]  ;;  %v2146_v27 = vld [vmem:[#allocation4 + $0x50] sm:$0xff] }
 0x44d   : > { %v2176_v34 = vadd.f32 %v2144_v52, %v3847_v45  ;;  %v2147_v22 = vld [vmem:[#allocation4 + $0xc8] sm:$0xff]  ;;  %v2177_v21 = vadd.f32 %v2145_v1, %v3815_v5  ;;  %v2148_v31 = vld [vmem:[#allocation4 + $0x70] sm:$0xff]  ;;  %v2178_v54 = vadd.f32 %v2146_v27, %v3842_v35  ;;  %v2149_v2 = vld [vmem:[#allocation4 + $0xe0] sm:$0xff] }
 0x44e   : > { %2205 = vst [vmem:[#allocation4 + $0x18] sm:$0xff] %v2173_v8  ;;  %v2179_v36 = vadd.f32 %v2147_v22, %v3900_v62  ;;  %v2150_v11 = vld [vmem:[#allocation4 + $0x30] sm:$0xff]  ;;  %v2180_v9 = vadd.f32 %v2148_v31, %v3884_v32  ;;  %v2151_v26 = vld [vmem:[#allocation4 + $0xb8] sm:$0xff]  ;;  %v2181_v45 = vadd.f32 %v2149_v2, %v3869_v61  ;;  %v2152_v43 = vld [vmem:[#allocation4 + $0xa0] sm:$0xff] }
 0x44f   : > { %2206 = vst [vmem:[#allocation4 + $0x90] sm:$0xff] %v2174_v50  ;;  %v2182_v5 = vadd.f32 %v2150_v11, %v3927_v6  ;;  %v2153_v59 = vld [vmem:[#allocation4 + $0xc0] sm:$0xff]  ;;  %v2183_v35 = vadd.f32 %v2151_v26, %v3909_v29  ;;  %v2154_v44 = vld [vmem:[#allocation4 + $0xb0] sm:$0xff]  ;;  %v2184_v62 = vadd.f32 %v2152_v43, %v3906_v20  ;;  %v2157_v0 = vld [vmem:[#allocation4 + $0x58] sm:$0xff] }
 0x450   : > { %2207 = vst [vmem:[#allocation4 + $0x48] sm:$0xff] %v2175_v30  ;;  %v2155_v63 = vld [vmem:[#allocation4 + $0x20] sm:$0xff]  ;;  %v2185_v32 = vadd.f32 %v2153_v59, %v3966_v46  ;;  %v2186_v61 = vadd.f32 %v2154_v44, %v3948_v17  ;;  %v2159_v13 = vld [vmem:[#allocation4 + $0xd8] sm:$0xff]  ;;  %v2189_v20 = vadd.f32 %v2157_v0, %v4022_v41  ;;  %v2160_v23 = vld [vmem:[#allocation4 + $0x10] sm:$0xff] }
 0x451   : > { %2208 = vst [vmem:[#allocation4 + $0x80] sm:$0xff] %v2176_v34  ;;  %v2156_v19 = vld [vmem:[#allocation4] sm:$0xff]  ;;  %v2187_v6 = vadd.f32 %v2155_v63, %v3936_v55  ;;  %v2161_v57 = vld [vmem:[#allocation4 + $0x28] sm:$0xff]  ;;  %v2191_v17 = vadd.f32 %v2159_v13, %v4062_v4  ;;  %v2192_v55 = vadd.f32 %v2160_v23, %v4057_v39  ;;  %v2163_v25 = vld [vmem:[#allocation4 + $0x98] sm:$0xff] }
 0x452   : > { %2209 = vst [vmem:[#allocation4 + $0x78] sm:$0xff] %v2177_v21  ;;  %v2158_v47 = vld [vmem:[#allocation4 + $0x40] sm:$0xff]  ;;  %v2188_v29 = vadd.f32 %v2156_v19, %v4031_v51  ;;  %v2162_v48 = vld [vmem:[#allocation4 + $0xa8] sm:$0xff]  ;;  %v2193_v51 = vadd.f32 %v2161_v57, %v4035_v53  ;;  %v2164_v12 = vld [vmem:[#allocation4 + $0xd0] sm:$0xff] }
 0x453   : > { %2210 = vst [vmem:[#allocation4 + $0x50] sm:$0xff] %v2178_v54  ;;  %v2190_v46 = vadd.f32 %v2158_v47, %v4000_v38  ;;  %v2194_v41 = vadd.f32 %v2162_v48, %v4099_v33  ;;  %v2165_v18 = vld [vmem:[#allocation4 + $0xf0] sm:$0xff]  ;;  %v2195_v38 = vadd.f32 %v2163_v25, %v4084_v24  ;;  %v2166_v3 = vld [vmem:[#allocation4 + $0xf8] sm:$0xff]  ;;  %v2196_v4 = vadd.f32 %v2164_v12, %v4070_v40  ;;  %v2167_v10 = vld [vmem:[#allocation4 + $0x68] sm:$0xff] }
 0x454   : > { %2211 = vst [vmem:[#allocation4 + $0xc8] sm:$0xff] %v2179_v36  ;;  %v2197_v39 = vadd.f32 %v2165_v18, %v4122_v49  ;;  %v2168_v58 = vld [vmem:[#allocation4 + $0x88] sm:$0xff]  ;;  %v2198_v53 = vadd.f32 %v2166_v3, %v4115_v60  ;;  %v2199_v33 = vadd.f32 %v2167_v10, %v4112_v16  ;;  %v2170_v28 = vld [vmem:[#allocation4 + $0x60] sm:$0xff]  ;;  %v2172_v50 = vld [vmem:[#allocation4 + $0x38] sm:$0xff] }
 0x455   : > { %2212 = vst [vmem:[#allocation4 + $0x70] sm:$0xff] %v2180_v9  ;;  %v2169_v56 = vld [vmem:[#allocation4 + $0x8] sm:$0xff]  ;;  %v2200_v24 = vadd.f32 %v2168_v58, %v4138_v42  ;;  %v2202_v49 = vadd.f32 %v2170_v28, %v4130_v37  ;;  %v2204_v60 = vadd.f32 %v2172_v50, %v4141_v7 }
 0x456   : > { %2213 = vst [vmem:[#allocation4 + $0xe0] sm:$0xff] %v2181_v45  ;;  %v2171_v8 = vld [vmem:[#allocation4 + $0xe8] sm:$0xff]  ;;  %v2201_v40 = vadd.f32 %v2169_v56, %v4134_v14 }
 0x457   : > { %2214 = vst [vmem:[#allocation4 + $0x30] sm:$0xff] %v2182_v5  ;;  %v2203_v30 = vadd.f32 %v2171_v8, %v4145_v15 }
 0x458   : > { %2215 = vst [vmem:[#allocation4 + $0xb8] sm:$0xff] %v2183_v35 }
 0x459   : > { %2216 = vst [vmem:[#allocation4 + $0xa0] sm:$0xff] %v2184_v62 }
 0x45a   : > { %2217 = vst [vmem:[#allocation4 + $0xc0] sm:$0xff] %v2185_v32 }
 0x45b   : > { %2218 = vst [vmem:[#allocation4 + $0xb0] sm:$0xff] %v2186_v61 }
 0x45c   : > { %2219 = vst [vmem:[#allocation4 + $0x20] sm:$0xff] %v2187_v6 }
 0x45d   : > { %2220 = vst [vmem:[#allocation4] sm:$0xff] %v2188_v29 }
 0x45e   : > { %2221 = vst [vmem:[#allocation4 + $0x58] sm:$0xff] %v2189_v20 }
 0x45f   : > { %2222 = vst [vmem:[#allocation4 + $0x40] sm:$0xff] %v2190_v46 }
 0x460   : > { %2223 = vst [vmem:[#allocation4 + $0xd8] sm:$0xff] %v2191_v17 }
 0x461   : > { %2224 = vst [vmem:[#allocation4 + $0x10] sm:$0xff] %v2192_v55 }
 0x462   : > { %2225 = vst [vmem:[#allocation4 + $0x28] sm:$0xff] %v2193_v51 }
 0x463   : > { %2226 = vst [vmem:[#allocation4 + $0xa8] sm:$0xff] %v2194_v41 }
 0x464   : > { %2227 = vst [vmem:[#allocation4 + $0x98] sm:$0xff] %v2195_v38 }
 0x465   : > { %2228 = vst [vmem:[#allocation4 + $0xd0] sm:$0xff] %v2196_v4 }
 0x466   : > { %2229 = vst [vmem:[#allocation4 + $0xf0] sm:$0xff] %v2197_v39 }
 0x467   : > { %2230 = vst [vmem:[#allocation4 + $0xf8] sm:$0xff] %v2198_v53 }
 0x468   : > { %2231 = vst [vmem:[#allocation4 + $0x68] sm:$0xff] %v2199_v33 }
 0x469   : > { %2232 = vst [vmem:[#allocation4 + $0x88] sm:$0xff] %v2200_v24 }
 0x46a   : > { %2233 = vst [vmem:[#allocation4 + $0x8] sm:$0xff] %v2201_v40 }
 0x46b   : > { %2234 = vst [vmem:[#allocation4 + $0x60] sm:$0xff] %v2202_v49 }
 0x46c   : > { %2235 = vst [vmem:[#allocation4 + $0xe8] sm:$0xff] %v2203_v30 }
 0x46d   : > { %2236 = vst [vmem:[#allocation4 + $0x38] sm:$0xff] %v2204_v60 }
 0x46e PF: > { %v2238_v16 = vld [vmem:[#allocation4 + $0x18] sm:$0xff]  ;;  %s2271_s22 = scalar_select %p2702_p4, 0.33333334, 1.0  ;;  %v2239_v14 = vld [vmem:[#allocation4 + $0x90] sm:$0xff]  ;;  %v2240_v42 = vld [vmem:[#allocation4 + $0x48] sm:$0xff] }
 0x46f   : > { %v2241_v52 = vld [vmem:[#allocation4 + $0x80] sm:$0xff]  ;;  %v2242_v37 = vld [vmem:[#allocation4 + $0x78] sm:$0xff]  ;;  %v2243_v34 = vld [vmem:[#allocation4 + $0x50] sm:$0xff]  ;;  %s3445_s18 = smov [#allocation14]   ;;  %s2347_s6 = sshll.u32 %s4277_s4, 4  ;;  %s2348_s6 = int_to_ptr.hbm [resolvable:$true] %s2347_s6 }
 0x470   : > { %v4217_v1 = vstv %s2271_s22  ;;  %v2244_v21 = vld [vmem:[#allocation4 + $0xc8] sm:$0xff]  ;;  %v2245_v54 = vld [vmem:[#allocation4 + $0x70] sm:$0xff]  ;;  %v2246_v36 = vld [vmem:[#allocation4 + $0xe0] sm:$0xff]  ;;  %s2345_s27 = sshll.u32 %s3445_s18, 4  ;;  %p3102_p5 = scmp.eq.s32.totalorder %s3502_s21, 1  ;;  %s2346_s27 = int_to_ptr.vmem [resolvable:$true] %s2345_s27 }
 0x471   : > { %v2273_v15 = vmul.f32 %v4217_v1, %v2238_v16  ;;  %v2274_v27 = vmul.f32 %v4217_v1, %v2239_v14  ;;  %v2275_v7 = vmul.f32 %v4217_v1, %v2240_v42  ;;  %v2276_v22 = vmul.f32 %v4217_v1, %v2241_v52  ;;  %v2247_v9 = vld [vmem:[#allocation4 + $0x30] sm:$0xff]  ;;  %v2248_v45 = vld [vmem:[#allocation4 + $0xb8] sm:$0xff]  ;;  %v2249_v5 = vld [vmem:[#allocation4 + $0xa0] sm:$0xff]  ;;  %s3446_s7 = smov 128   ;;  %s3447_s8 = smov 8  }
 0x472   : > { %v2277_v31 = vmul.f32 %v4217_v1, %v2242_v37  ;;  %v2278_v2 = vmul.f32 %v4217_v1, %v2243_v34  ;;  %v2279_v11 = vmul.f32 %v4217_v1, %v2244_v21  ;;  %v2280_v26 = vmul.f32 %v4217_v1, %v2245_v54  ;;  %v2250_v35 = vld [vmem:[#allocation4 + $0xc0] sm:$0xff]  ;;  %v2251_v62 = vld [vmem:[#allocation4 + $0xb0] sm:$0xff]  ;;  %v2254_v6 = vld [vmem:[#allocation4 + $0x58] sm:$0xff] }
 0x473   : > { %2305 = vst [vmem:[#allocation14] sm:$0xff] %v2273_v15  ;;  %v2281_v43 = vmul.f32 %v4217_v1, %v2246_v36  ;;  %v2282_v59 = vmul.f32 %v4217_v1, %v2247_v9  ;;  %v2283_v44 = vmul.f32 %v4217_v1, %v2248_v45  ;;  %v2284_v63 = vmul.f32 %v4217_v1, %v2249_v5  ;;  %v2252_v32 = vld [vmem:[#allocation4 + $0x20] sm:$0xff]  ;;  %v2256_v20 = vld [vmem:[#allocation4 + $0xd8] sm:$0xff]  ;;  %v2257_v46 = vld [vmem:[#allocation4 + $0x10] sm:$0xff] }
 0x474   : > { %2306 = vst [vmem:[#allocation14 + $0x8] sm:$0xff] %v2274_v27  ;;  %v2285_v19 = vmul.f32 %v4217_v1, %v2250_v35  ;;  %v2253_v61 = vld [vmem:[#allocation4] sm:$0xff]  ;;  %v2286_v0 = vmul.f32 %v4217_v1, %v2251_v62  ;;  %v2287_v47 = vmul.f32 %v4217_v1, %v2252_v32  ;;  %v2289_v23 = vmul.f32 %v4217_v1, %v2254_v6  ;;  %v2258_v17 = vld [vmem:[#allocation4 + $0x28] sm:$0xff]  ;;  %v2260_v51 = vld [vmem:[#allocation4 + $0x98] sm:$0xff] }
 0x475   : > { %2307 = vst [vmem:[#allocation14 + $0x10] sm:$0xff] %v2275_v7  ;;  %v2255_v29 = vld [vmem:[#allocation4 + $0x40] sm:$0xff]  ;;  %v2288_v13 = vmul.f32 %v4217_v1, %v2253_v61  ;;  %v2291_v48 = vmul.f32 %v4217_v1, %v2256_v20  ;;  %v2259_v55 = vld [vmem:[#allocation4 + $0xa8] sm:$0xff]  ;;  %v2292_v25 = vmul.f32 %v4217_v1, %v2257_v46  ;;  %v2293_v12 = vmul.f32 %v4217_v1, %v2258_v17  ;;  %v2261_v41 = vld [vmem:[#allocation4 + $0xd0] sm:$0xff] }
 0x476   : > { %2308 = vst [vmem:[#allocation14 + $0x18] sm:$0xff] %v2276_v22  ;;  %v2290_v57 = vmul.f32 %v4217_v1, %v2255_v29  ;;  %v2294_v18 = vmul.f32 %v4217_v1, %v2259_v55  ;;  %v2262_v38 = vld [vmem:[#allocation4 + $0xf0] sm:$0xff]  ;;  %v2295_v3 = vmul.f32 %v4217_v1, %v2260_v51  ;;  %v2263_v4 = vld [vmem:[#allocation4 + $0xf8] sm:$0xff]  ;;  %v2296_v10 = vmul.f32 %v4217_v1, %v2261_v41  ;;  %v2264_v39 = vld [vmem:[#allocation4 + $0x68] sm:$0xff] }
 0x477   : > { %2309 = vst [vmem:[#allocation14 + $0x20] sm:$0xff] %v2277_v31  ;;  %v2297_v58 = vmul.f32 %v4217_v1, %v2262_v38  ;;  %v2265_v53 = vld [vmem:[#allocation4 + $0x88] sm:$0xff]  ;;  %v2298_v56 = vmul.f32 %v4217_v1, %v2263_v4  ;;  %v2299_v28 = vmul.f32 %v4217_v1, %v2264_v39  ;;  %v2267_v24 = vld [vmem:[#allocation4 + $0x60] sm:$0xff]  ;;  %v2269_v49 = vld [vmem:[#allocation4 + $0x38] sm:$0xff] }
 0x478   : > { %2310 = vst [vmem:[#allocation14 + $0x28] sm:$0xff] %v2278_v2  ;;  %v2266_v33 = vld [vmem:[#allocation4 + $0x8] sm:$0xff]  ;;  %v2300_v8 = vmul.f32 %v4217_v1, %v2265_v53  ;;  %v2302_v30 = vmul.f32 %v4217_v1, %v2267_v24  ;;  %v2304_v16 = vmul.f32 %v4217_v1, %v2269_v49 }
 0x479   : > { %2311 = vst [vmem:[#allocation14 + $0x30] sm:$0xff] %v2279_v11  ;;  %v2268_v40 = vld [vmem:[#allocation4 + $0xe8] sm:$0xff]  ;;  %v2301_v50 = vmul.f32 %v4217_v1, %v2266_v33 }
 0x47a   : > { %2312 = vst [vmem:[#allocation14 + $0x38] sm:$0xff] %v2280_v26  ;;  %v2303_v60 = vmul.f32 %v4217_v1, %v2268_v40 }
 0x47b   : > { %2313 = vst [vmem:[#allocation14 + $0x40] sm:$0xff] %v2281_v43 }
 0x47c   : > { %2314 = vst [vmem:[#allocation14 + $0x48] sm:$0xff] %v2282_v59 }
 0x47d   : > { %2315 = vst [vmem:[#allocation14 + $0x50] sm:$0xff] %v2283_v44 }
 0x47e   : > { %2316 = vst [vmem:[#allocation14 + $0x58] sm:$0xff] %v2284_v63 }
 0x47f   : > { %2317 = vst [vmem:[#allocation14 + $0x60] sm:$0xff] %v2285_v19 }
 0x480   : > { %2318 = vst [vmem:[#allocation14 + $0x68] sm:$0xff] %v2286_v0 }
 0x481   : > { %2319 = vst [vmem:[#allocation14 + $0x70] sm:$0xff] %v2287_v47 }
 0x482   : > { %2320 = vst [vmem:[#allocation14 + $0x78] sm:$0xff] %v2288_v13 }
 0x483   : > { %2321 = vst [vmem:[#allocation14 + $0x80] sm:$0xff] %v2289_v23 }
 0x484   : > { %2322 = vst [vmem:[#allocation14 + $0x88] sm:$0xff] %v2290_v57 }
 0x485   : > { %2323 = vst [vmem:[#allocation14 + $0x90] sm:$0xff] %v2291_v48 }
 0x486   : > { %2324 = vst [vmem:[#allocation14 + $0x98] sm:$0xff] %v2292_v25 }
 0x487   : > { %2325 = vst [vmem:[#allocation14 + $0xa0] sm:$0xff] %v2293_v12 }
 0x488   : > { %2326 = vst [vmem:[#allocation14 + $0xa8] sm:$0xff] %v2294_v18 }
 0x489   : > { %2327 = vst [vmem:[#allocation14 + $0xb0] sm:$0xff] %v2295_v3 }
 0x48a   : > { %2328 = vst [vmem:[#allocation14 + $0xb8] sm:$0xff] %v2296_v10 }
 0x48b   : > { %2329 = vst [vmem:[#allocation14 + $0xc0] sm:$0xff] %v2297_v58 }
 0x48c   : > { %2330 = vst [vmem:[#allocation14 + $0xc8] sm:$0xff] %v2298_v56 }
 0x48d   : > { %2331 = vst [vmem:[#allocation14 + $0xd0] sm:$0xff] %v2299_v28 }
 0x48e   : > { %2332 = vst [vmem:[#allocation14 + $0xd8] sm:$0xff] %v2300_v8 }
 0x48f   : > { %2333 = vst [vmem:[#allocation14 + $0xe0] sm:$0xff] %v2301_v50 }
 0x490   : > { %2334 = vst [vmem:[#allocation14 + $0xe8] sm:$0xff] %v2302_v30 }
 0x491   : > { %2335 = vst [vmem:[#allocation14 + $0xf0] sm:$0xff] %v2303_v60 }
 0x492   : > { %2336 = vst [vmem:[#allocation14 + $0xf8] sm:$0xff] %v2304_v16 }
 0x493   : > { %3078 = dma.vmem_to_hbm [thread:$0]  (%p3102_p5), %s2346_s27, 4096, %s2348_s6, [#allocation8], %s3446_s7, %s3446_s7, %s3447_s8  }
 0x494   : > { %3413 = dma.done.wait (%p3102_p5), [#allocation8], 4096  }
 0x495   : > { %3415 = vsyncadd (%p3102_p5), [#allocation8], 4294963200 }
 0x496 PF: > { %s24_s20 = sadd.s32 1, %s3438_s20   ;;  %s4280_s15 = smov %s3422_s16 }
 0x497   : > { %p21_p6 = scmp.ge.s32.totalorder %s24_s20, 4   ;;  %s4281_s16 = smov %s3426_s17 }
 0x498   : > { %s4282_s17 = smov %s3563_s12  ;;  %s4283_s18 = smov %s3434_s19 }
 0x499   : > { %s4284_s19 = smov %s4286_s24  ;;  %23 = sbr.rel (!%p21_p6) target bundleno = 9 (0x9), region = 145 }
 0x49e   :  { %2364 = vsyncpa [#allocation7], 1 }
 0x49f   :  { %2366 = vsyncpa [#allocation7 + $0x1], 1 }
 0x4a0   :  { %2367 = vsyncpa [#allocation10], 1 }
 0x4a1   :  { %2369 = vsyncpa [#allocation10 + $0x1], 1 }
 0x4a2   :  { %2370 = vsyncpa [#allocation13], 1 }
 0x4a3   :  { %2372 = vsyncpa [#allocation13 + $0x1], 1 }
 0x4a4   :  { %2373 = vsyncpa [#allocation8], 1 }
 0x4a5   :  { %2375 = vsyncpa [#allocation8 + $0x1], 1 }

</bundles_post_ra>
